<compile_context>
chip_gen: v7x
topology: tpu7x:2x2x1
jax: 0.10.0
libtpu: 0.0.40
codegen_flags: <defaults>
</compile_context>

<pallas_src>
import jax
import jax.numpy as jnp
import numpy as np
from jax.experimental import pallas as pl
from jax.experimental.pallas import tpu as pltpu


def _dims(H, W):
    H1, W1 = H - 2, W - 2                    # after conv1 (3x3, valid)
    Hp, Wp = -(-H1 // 2), -(-W1 // 2)        # after maxpool 2x2 stride 2, ceil
    H2, W2 = Hp - 2, Wp - 2                  # after conv2 (3x3, valid)
    H3, W3 = H2 - 2, W2 - 2                  # after conv3 (3x3, valid)
    return H1, W1, Hp, Wp, H2, W2, H3, W3


def _make_pnet_kernel(H, W):
    H1, W1, Hp, Wp, H2, W2, H3, W3 = _dims(H, W)
    QP = Hp * Wp                      # rows per pooling quadrant
    L2 = (H2 - 1) * Wp + W2           # wide-row length of conv2 output
    L3 = (H3 - 1) * Wp + W3           # wide-row length of conv3 output / heads

    def kernel(xq_ref,
               w1_ref, b1_ref, a1_ref,
               w2_ref, b2_ref, a2_ref,
               w3_ref, b3_ref, a3_ref,
               wh_ref, bh_ref,
               out_ref):
        # ---- conv1 + prelu1 on all four pooling quadrants: ONE matmul ----
        y = jnp.dot(xq_ref[0], w1_ref[...],
                    preferred_element_type=jnp.float32) + b1_ref[...]
        y = jnp.where(y > 0.0, y, y * a1_ref[...])            # (4*QP, 10)

        # ---- pool1: MaxPool2d(2,2,ceil) == max over the 4 quadrant slabs ----
        pooled = jnp.maximum(
            jnp.maximum(y[0:QP], y[QP:2 * QP]),
            jnp.maximum(y[2 * QP:3 * QP], y[3 * QP:4 * QP]))   # (QP, 10)

        def conv3x3(src, L, w_ref, b_ref, a_ref):
            # 3x3 valid conv on a slab with row stride Wp: one matmul per tap.
            acc = jnp.dot(src[0:L, :], w_ref[0],
                          preferred_element_type=jnp.float32)
            for kh in range(3):
                for kw in range(3):
                    if kh == 0 and kw == 0:
                        continue
                    off = kh * Wp + kw
                    acc = acc + jnp.dot(src[off:off + L, :], w_ref[kh * 3 + kw],
                                        preferred_element_type=jnp.float32)
            z = acc + b_ref[...]
            return jnp.where(z > 0.0, z, z * a_ref[...])       # PReLU

        c2 = conv3x3(pooled, L2, w2_ref, b2_ref, a2_ref)       # (L2, 16)
        c3 = conv3x3(c2, L3, w3_ref, b3_ref, a3_ref)           # (L3, 32)

        # ---- fused heads: conv4_1 (2-way softmax) + conv4_2 ----
        yh = jnp.dot(c3, wh_ref[...],
                     preferred_element_type=jnp.float32) + bh_ref[...]  # (L3, 6)
        d = yh[:, 1:2] - yh[:, 0:1]
        p1 = 1.0 / (1.0 + jnp.exp(-d))       # softmax([l0, l1])[1]
        col = jax.lax.broadcasted_iota(jnp.int32, (L3, 6), 1)
        out = jnp.where(col == 0, 1.0 - p1, jnp.where(col == 1, p1, yh))
        out_ref[0] = out                     # single slab store per image

    return kernel


def _conv_w_taps(w):
    """(Co, Ci, KH, KW) -> (KH*KW, Ci, Co)."""
    Co, Ci, KH, KW = w.shape
    return jnp.transpose(w, (2, 3, 1, 0)).reshape(KH * KW, Ci, Co)


@jax.jit
def pnet_forward(x_nchw, params):
    N, Cin, H, W = x_nchw.shape
    assert Cin == 3
    H1, W1, Hp, Wp, H2, W2, H3, W3 = _dims(H, W)
    QP = Hp * Wp
    L3 = (H3 - 1) * Wp + W3
    kernel = _make_pnet_kernel(H, W)

    # -------- wrapper-side layout glue (plain JAX, no FLOPs) --------
    x_nhwc = jnp.transpose(x_nchw, (0, 2, 3, 1))                       # (N,H,W,3)
    # im2col patches for conv1, channel innermost: (N, H1, W1, 27)
    patches = jnp.concatenate(
        [x_nhwc[:, kh:kh + H1, kw:kw + W1, :]
         for kh in range(3) for kw in range(3)], axis=-1)
    # Gather patches at the four 2x2 pooling quadrant positions (clamped
    # indices implement ceil_mode) and stack them along rows.
    quads = []
    for di in (0, 1):
        for dj in (0, 1):
            hi = np.minimum(2 * np.arange(Hp) + di, H1 - 1)
            wj = np.minimum(2 * np.arange(Wp) + dj, W1 - 1)
            q = patches[:, hi][:, :, wj]                               # (N,Hp,Wp,27)
            quads.append(q.reshape(N, QP, 27))
    xq = jnp.concatenate(quads, axis=1)                                # (N,4*QP,27)

    w1f = jnp.transpose(params['w1'], (2, 3, 1, 0)).reshape(27, 10)    # (27,10)
    w2t = _conv_w_taps(params['w2'])                                   # (9,10,16)
    w3t = _conv_w_taps(params['w3'])                                   # (9,16,32)
    w41t = jnp.transpose(params['w41'][:, :, 0, 0], (1, 0))            # (32,2)
    w42t = jnp.transpose(params['w42'][:, :, 0, 0], (1, 0))            # (32,4)
    wh = jnp.concatenate([w41t, w42t], axis=1)                         # (32,6)

    def row(v):
        return v.reshape(1, -1).astype(jnp.float32)

    b1, a1 = row(params['b1']), row(params['a1'])
    b2, a2 = row(params['b2']), row(params['a2'])
    b3, a3 = row(params['b3']), row(params['a3'])
    bh = row(jnp.concatenate([params['b41'], params['b42']]))          # (1,6)

    def full_spec(shape):
        nd = len(shape)
        return pl.BlockSpec(shape, lambda n, _nd=nd: (0,) * _nd)

    in_specs = [
        pl.BlockSpec((1, 4 * QP, 27), lambda n: (n, 0, 0)),            # xq
        full_spec(w1f.shape), full_spec(b1.shape), full_spec(a1.shape),
        full_spec(w2t.shape), full_spec(b2.shape), full_spec(a2.shape),
        full_spec(w3t.shape), full_spec(b3.shape), full_spec(a3.shape),
        full_spec(wh.shape), full_spec(bh.shape),
    ]
    out_specs = pl.BlockSpec((1, L3, 6), lambda n: (n, 0, 0))

    out_wide = pl.pallas_call(
        kernel,
        out_shape=jax.ShapeDtypeStruct((N, L3, 6), jnp.float32),
        grid_spec=pltpu.PrefetchScalarGridSpec(
            num_scalar_prefetch=0,
            grid=(N,),
            in_specs=in_specs,
            out_specs=out_specs),
        compiler_params=pltpu.CompilerParams(
            dimension_semantics=("parallel",)),
    )(xq, w1f, b1, a1, w2t, b2, a2, w3t, b3, a3, wh, bh)

    # Extract the valid rows of the wide layout (row stride Wp) and split heads.
    idx = np.array([i * Wp + j for i in range(H3) for j in range(W3)])
    valid = out_wide[:, idx, :]                                        # (N,H3*W3,6)
    probs = jnp.transpose(valid[..., 0:2].reshape(N, H3, W3, 2), (0, 3, 1, 2))
    boxes = jnp.transpose(valid[..., 2:6].reshape(N, H3, W3, 4), (0, 3, 1, 2))
    return probs, boxes


def ref_forward(x, p):
    """Pure-JAX reference mirroring the PyTorch PNet.forward (NCHW)."""
    dn = ('NCHW', 'OIHW', 'NCHW')

    def conv(x, w, b):
        y = jax.lax.conv_general_dilated(
            x, w, (1, 1), 'VALID', dimension_numbers=dn,
            precision=jax.lax.Precision.HIGHEST)
        return y + b[None, :, None, None]

    def prelu(x, a):
        return jnp.where(x > 0, x, x * a[None, :, None, None])

    h = prelu(conv(x, p['w1'], p['b1']), p['a1'])
    # 14x14 -> 7x7 is exact, so VALID matches ceil_mode=True here.
    h = jax.lax.reduce_window(h, -jnp.inf, jax.lax.max,
                              (1, 1, 2, 2), (1, 1, 2, 2), 'VALID')
    h = prelu(conv(h, p['w2'], p['b2']), p['a2'])
    h = prelu(conv(h, p['w3'], p['b3']), p['a3'])
    probs = jax.nn.softmax(conv(h, p['w41'], p['b41']), axis=1)
    boxes = conv(h, p['w42'], p['b42'])
    return probs, boxes


if __name__ == "__main__":
    key = jax.random.PRNGKey(0)
    ks = jax.random.split(key, 15)

    N, H, W = 2, 16, 16
    x = jax.random.normal(ks[0], (N, 3, H, W), jnp.float32)

    # TODO(synk): real weights come from weights/pnet.npy; synthetic params here.
    params = {
        'w1': jax.random.normal(ks[1], (10, 3, 3, 3), jnp.float32) * 0.2,
        'b1': jax.random.normal(ks[2], (10,), jnp.float32) * 0.1,
        'a1': jax.random.uniform(ks[3], (10,), jnp.float32, 0.1, 0.4),
        'w2': jax.random.normal(ks[4], (16, 10, 3, 3), jnp.float32) * 0.15,
        'b2': jax.random.normal(ks[5], (16,), jnp.float32) * 0.1,
        'a2': jax.random.uniform(ks[6], (16,), jnp.float32, 0.1, 0.4),
        'w3': jax.random.normal(ks[7], (32, 16, 3, 3), jnp.float32) * 0.1,
        'b3': jax.random.normal(ks[8], (32,), jnp.float32) * 0.1,
        'a3': jax.random.uniform(ks[9], (32,), jnp.float32, 0.1, 0.4),
        'w41': jax.random.normal(ks[10], (2, 32, 1, 1), jnp.float32) * 0.2,
        'b41': jax.random.normal(ks[11], (2,), jnp.float32) * 0.1,
        'w42': jax.random.normal(ks[12], (4, 32, 1, 1), jnp.float32) * 0.2,
        'b42': jax.random.normal(ks[13], (4,), jnp.float32) * 0.1,
    }

    probs, boxes = pnet_forward(x, params)
    jax.block_until_ready((probs, boxes))

    probs_ref, boxes_ref = ref_forward(x, params)
    np.testing.assert_allclose(np.asarray(probs), np.asarray(probs_ref),
                               rtol=2e-2, atol=3e-2)
    np.testing.assert_allclose(np.asarray(boxes), np.asarray(boxes_ref),
                               rtol=2e-2, atol=3e-2)
    assert probs.shape == (N, 2, 3, 3) and boxes.shape == (N, 4, 3, 3)

    print("KERNEL_OK")
</pallas_src>

<mosaic_0001>
module attributes {stable_mosaic.version = 11 : i64} {
  func.func @kernel(%arg0: i32, %arg1: memref<1x196x27xf32, #tpu.memory_space<vmem>>, %arg2: memref<27x10xf32, #tpu.memory_space<vmem>>, %arg3: memref<1x10xf32, #tpu.memory_space<vmem>>, %arg4: memref<1x10xf32, #tpu.memory_space<vmem>>, %arg5: memref<9x10x16xf32, #tpu.memory_space<vmem>>, %arg6: memref<1x16xf32, #tpu.memory_space<vmem>>, %arg7: memref<1x16xf32, #tpu.memory_space<vmem>>, %arg8: memref<9x16x32xf32, #tpu.memory_space<vmem>>, %arg9: memref<1x32xf32, #tpu.memory_space<vmem>>, %arg10: memref<1x32xf32, #tpu.memory_space<vmem>>, %arg11: memref<32x6xf32, #tpu.memory_space<vmem>>, %arg12: memref<1x6xf32, #tpu.memory_space<vmem>>, %arg13: memref<1x17x6xf32, #tpu.memory_space<vmem>>) attributes {dimension_semantics = [#tpu.dimension_semantics<parallel>], iteration_bounds = array<i64: 2>, scalar_prefetch = 0 : i64, scratch_operands = 0 : i64, tpu.core_type = #tpu.core_type<tc>, window_params = [{transform_indices = @transform_0, window_bounds = array<i64: 1, 196, 27>}, {pipeline_mode = #tpu.pipeline_mode<synchronous>, transform_indices = @transform_1, window_bounds = array<i64: 27, 10>}, {pipeline_mode = #tpu.pipeline_mode<synchronous>, transform_indices = @transform_2, window_bounds = array<i64: 1, 10>}, {pipeline_mode = #tpu.pipeline_mode<synchronous>, transform_indices = @transform_3, window_bounds = array<i64: 1, 10>}, {pipeline_mode = #tpu.pipeline_mode<synchronous>, transform_indices = @transform_4, window_bounds = array<i64: 9, 10, 16>}, {pipeline_mode = #tpu.pipeline_mode<synchronous>, transform_indices = @transform_5, window_bounds = array<i64: 1, 16>}, {pipeline_mode = #tpu.pipeline_mode<synchronous>, transform_indices = @transform_6, window_bounds = array<i64: 1, 16>}, {pipeline_mode = #tpu.pipeline_mode<synchronous>, transform_indices = @transform_7, window_bounds = array<i64: 9, 16, 32>}, {pipeline_mode = #tpu.pipeline_mode<synchronous>, transform_indices = @transform_8, window_bounds = array<i64: 1, 32>}, {pipeline_mode = #tpu.pipeline_mode<synchronous>, transform_indices = @transform_9, window_bounds = array<i64: 1, 32>}, {pipeline_mode = #tpu.pipeline_mode<synchronous>, transform_indices = @transform_10, window_bounds = array<i64: 32, 6>}, {pipeline_mode = #tpu.pipeline_mode<synchronous>, transform_indices = @transform_11, window_bounds = array<i64: 1, 6>}, {transform_indices = @transform_12, window_bounds = array<i64: 1, 17, 6>}]} {
    %c0 = arith.constant 0 : index
    %c0_0 = arith.constant 0 : index
    %c0_1 = arith.constant 0 : index
    %0 = vector.load %arg1[%c0, %c0_0, %c0_1] : memref<1x196x27xf32, #tpu.memory_space<vmem>>, vector<1x196x27xf32>
    %1 = vector.shape_cast %0 : vector<1x196x27xf32> to vector<196x27xf32>
    %c0_2 = arith.constant 0 : index
    %c0_3 = arith.constant 0 : index
    %2 = vector.load %arg2[%c0_2, %c0_3] : memref<27x10xf32, #tpu.memory_space<vmem>>, vector<27x10xf32>
    %cst = arith.constant dense<0.000000e+00> : vector<196x10xf32>
    %3 = tpu.matmul %1, %2, %cst {dimension_numbers = #tpu.dot_dimension_numbers<[1], [0], [0], [1], [0, 0, 1, 1], [], []>} : vector<196x27xf32>, vector<27x10xf32>, vector<196x10xf32> -> vector<196x10xf32>
    %c0_4 = arith.constant 0 : index
    %c0_5 = arith.constant 0 : index
    %4 = vector.load %arg3[%c0_4, %c0_5] : memref<1x10xf32, #tpu.memory_space<vmem>>, vector<1x10xf32>
    %5 = vector.broadcast %4 : vector<1x10xf32> to vector<196x10xf32>
    %6 = arith.addf %3, %5 : vector<196x10xf32>
    %cst_6 = arith.constant 0.000000e+00 : f32
    %7 = vector.broadcast %cst_6 : f32 to vector<196x10xf32>
    %8 = arith.cmpf ogt, %6, %7 : vector<196x10xf32>
    %c0_7 = arith.constant 0 : index
    %c0_8 = arith.constant 0 : index
    %9 = vector.load %arg4[%c0_7, %c0_8] : memref<1x10xf32, #tpu.memory_space<vmem>>, vector<1x10xf32>
    %10 = vector.broadcast %9 : vector<1x10xf32> to vector<196x10xf32>
    %11 = arith.mulf %6, %10 : vector<196x10xf32>
    %12 = arith.select %8, %6, %11 : vector<196x10xi1>, vector<196x10xf32>
    %13 = vector.extract_strided_slice %12 {offsets = [0, 0], sizes = [49, 10], strides = [1, 1]} : vector<196x10xf32> to vector<49x10xf32>
    %14 = vector.extract_strided_slice %12 {offsets = [49, 0], sizes = [49, 10], strides = [1, 1]} : vector<196x10xf32> to vector<49x10xf32>
    %15 = arith.maximumf %13, %14 : vector<49x10xf32>
    %16 = vector.extract_strided_slice %12 {offsets = [98, 0], sizes = [49, 10], strides = [1, 1]} : vector<196x10xf32> to vector<49x10xf32>
    %17 = vector.extract_strided_slice %12 {offsets = [147, 0], sizes = [49, 10], strides = [1, 1]} : vector<196x10xf32> to vector<49x10xf32>
    %18 = arith.maximumf %16, %17 : vector<49x10xf32>
    %19 = arith.maximumf %15, %18 : vector<49x10xf32>
    %20 = vector.extract_strided_slice %19 {offsets = [0, 0], sizes = [33, 10], strides = [1, 1]} : vector<49x10xf32> to vector<33x10xf32>
    %c0_9 = arith.constant 0 : index
    %c0_10 = arith.constant 0 : index
    %c0_11 = arith.constant 0 : index
    %21 = vector.load %arg5[%c0_9, %c0_10, %c0_11] : memref<9x10x16xf32, #tpu.memory_space<vmem>>, vector<1x10x16xf32>
    %22 = vector.shape_cast %21 : vector<1x10x16xf32> to vector<10x16xf32>
    %cst_12 = arith.constant dense<0.000000e+00> : vector<33x16xf32>
    %23 = tpu.matmul %20, %22, %cst_12 {dimension_numbers = #tpu.dot_dimension_numbers<[1], [0], [0], [1], [0, 0, 1, 1], [], []>} : vector<33x10xf32>, vector<10x16xf32>, vector<33x16xf32> -> vector<33x16xf32>
    %24 = vector.extract_strided_slice %19 {offsets = [1, 0], sizes = [33, 10], strides = [1, 1]} : vector<49x10xf32> to vector<33x10xf32>
    %c1 = arith.constant 1 : index
    %c0_13 = arith.constant 0 : index
    %c0_14 = arith.constant 0 : index
    %25 = vector.load %arg5[%c1, %c0_13, %c0_14] : memref<9x10x16xf32, #tpu.memory_space<vmem>>, vector<1x10x16xf32>
    %26 = vector.shape_cast %25 : vector<1x10x16xf32> to vector<10x16xf32>
    %cst_15 = arith.constant dense<0.000000e+00> : vector<33x16xf32>
    %27 = tpu.matmul %24, %26, %cst_15 {dimension_numbers = #tpu.dot_dimension_numbers<[1], [0], [0], [1], [0, 0, 1, 1], [], []>} : vector<33x10xf32>, vector<10x16xf32>, vector<33x16xf32> -> vector<33x16xf32>
    %28 = arith.addf %23, %27 : vector<33x16xf32>
    %29 = vector.extract_strided_slice %19 {offsets = [2, 0], sizes = [33, 10], strides = [1, 1]} : vector<49x10xf32> to vector<33x10xf32>
    %c2 = arith.constant 2 : index
    %c0_16 = arith.constant 0 : index
    %c0_17 = arith.constant 0 : index
    %30 = vector.load %arg5[%c2, %c0_16, %c0_17] : memref<9x10x16xf32, #tpu.memory_space<vmem>>, vector<1x10x16xf32>
    %31 = vector.shape_cast %30 : vector<1x10x16xf32> to vector<10x16xf32>
    %cst_18 = arith.constant dense<0.000000e+00> : vector<33x16xf32>
    %32 = tpu.matmul %29, %31, %cst_18 {dimension_numbers = #tpu.dot_dimension_numbers<[1], [0], [0], [1], [0, 0, 1, 1], [], []>} : vector<33x10xf32>, vector<10x16xf32>, vector<33x16xf32> -> vector<33x16xf32>
    %33 = arith.addf %28, %32 : vector<33x16xf32>
    %34 = vector.extract_strided_slice %19 {offsets = [7, 0], sizes = [33, 10], strides = [1, 1]} : vector<49x10xf32> to vector<33x10xf32>
    %c3 = arith.constant 3 : index
    %c0_19 = arith.constant 0 : index
    %c0_20 = arith.constant 0 : index
    %35 = vector.load %arg5[%c3, %c0_19, %c0_20] : memref<9x10x16xf32, #tpu.memory_space<vmem>>, vector<1x10x16xf32>
    %36 = vector.shape_cast %35 : vector<1x10x16xf32> to vector<10x16xf32>
    %cst_21 = arith.constant dense<0.000000e+00> : vector<33x16xf32>
    %37 = tpu.matmul %34, %36, %cst_21 {dimension_numbers = #tpu.dot_dimension_numbers<[1], [0], [0], [1], [0, 0, 1, 1], [], []>} : vector<33x10xf32>, vector<10x16xf32>, vector<33x16xf32> -> vector<33x16xf32>
    %38 = arith.addf %33, %37 : vector<33x16xf32>
    %39 = vector.extract_strided_slice %19 {offsets = [8, 0], sizes = [33, 10], strides = [1, 1]} : vector<49x10xf32> to vector<33x10xf32>
    %c4 = arith.constant 4 : index
    %c0_22 = arith.constant 0 : index
    %c0_23 = arith.constant 0 : index
    %40 = vector.load %arg5[%c4, %c0_22, %c0_23] : memref<9x10x16xf32, #tpu.memory_space<vmem>>, vector<1x10x16xf32>
    %41 = vector.shape_cast %40 : vector<1x10x16xf32> to vector<10x16xf32>
    %cst_24 = arith.constant dense<0.000000e+00> : vector<33x16xf32>
    %42 = tpu.matmul %39, %41, %cst_24 {dimension_numbers = #tpu.dot_dimension_numbers<[1], [0], [0], [1], [0, 0, 1, 1], [], []>} : vector<33x10xf32>, vector<10x16xf32>, vector<33x16xf32> -> vector<33x16xf32>
    %43 = arith.addf %38, %42 : vector<33x16xf32>
    %44 = vector.extract_strided_slice %19 {offsets = [9, 0], sizes = [33, 10], strides = [1, 1]} : vector<49x10xf32> to vector<33x10xf32>
    %c5 = arith.constant 5 : index
    %c0_25 = arith.constant 0 : index
    %c0_26 = arith.constant 0 : index
    %45 = vector.load %arg5[%c5, %c0_25, %c0_26] : memref<9x10x16xf32, #tpu.memory_space<vmem>>, vector<1x10x16xf32>
    %46 = vector.shape_cast %45 : vector<1x10x16xf32> to vector<10x16xf32>
    %cst_27 = arith.constant dense<0.000000e+00> : vector<33x16xf32>
    %47 = tpu.matmul %44, %46, %cst_27 {dimension_numbers = #tpu.dot_dimension_numbers<[1], [0], [0], [1], [0, 0, 1, 1], [], []>} : vector<33x10xf32>, vector<10x16xf32>, vector<33x16xf32> -> vector<33x16xf32>
    %48 = arith.addf %43, %47 : vector<33x16xf32>
    %49 = vector.extract_strided_slice %19 {offsets = [14, 0], sizes = [33, 10], strides = [1, 1]} : vector<49x10xf32> to vector<33x10xf32>
    %c6 = arith.constant 6 : index
    %c0_28 = arith.constant 0 : index
    %c0_29 = arith.constant 0 : index
    %50 = vector.load %arg5[%c6, %c0_28, %c0_29] : memref<9x10x16xf32, #tpu.memory_space<vmem>>, vector<1x10x16xf32>
    %51 = vector.shape_cast %50 : vector<1x10x16xf32> to vector<10x16xf32>
    %cst_30 = arith.constant dense<0.000000e+00> : vector<33x16xf32>
    %52 = tpu.matmul %49, %51, %cst_30 {dimension_numbers = #tpu.dot_dimension_numbers<[1], [0], [0], [1], [0, 0, 1, 1], [], []>} : vector<33x10xf32>, vector<10x16xf32>, vector<33x16xf32> -> vector<33x16xf32>
    %53 = arith.addf %48, %52 : vector<33x16xf32>
    %54 = vector.extract_strided_slice %19 {offsets = [15, 0], sizes = [33, 10], strides = [1, 1]} : vector<49x10xf32> to vector<33x10xf32>
    %c7 = arith.constant 7 : index
    %c0_31 = arith.constant 0 : index
    %c0_32 = arith.constant 0 : index
    %55 = vector.load %arg5[%c7, %c0_31, %c0_32] : memref<9x10x16xf32, #tpu.memory_space<vmem>>, vector<1x10x16xf32>
    %56 = vector.shape_cast %55 : vector<1x10x16xf32> to vector<10x16xf32>
    %cst_33 = arith.constant dense<0.000000e+00> : vector<33x16xf32>
    %57 = tpu.matmul %54, %56, %cst_33 {dimension_numbers = #tpu.dot_dimension_numbers<[1], [0], [0], [1], [0, 0, 1, 1], [], []>} : vector<33x10xf32>, vector<10x16xf32>, vector<33x16xf32> -> vector<33x16xf32>
    %58 = arith.addf %53, %57 : vector<33x16xf32>
    %59 = vector.extract_strided_slice %19 {offsets = [16, 0], sizes = [33, 10], strides = [1, 1]} : vector<49x10xf32> to vector<33x10xf32>
    %c8 = arith.constant 8 : index
    %c0_34 = arith.constant 0 : index
    %c0_35 = arith.constant 0 : index
    %60 = vector.load %arg5[%c8, %c0_34, %c0_35] : memref<9x10x16xf32, #tpu.memory_space<vmem>>, vector<1x10x16xf32>
    %61 = vector.shape_cast %60 : vector<1x10x16xf32> to vector<10x16xf32>
    %cst_36 = arith.constant dense<0.000000e+00> : vector<33x16xf32>
    %62 = tpu.matmul %59, %61, %cst_36 {dimension_numbers = #tpu.dot_dimension_numbers<[1], [0], [0], [1], [0, 0, 1, 1], [], []>} : vector<33x10xf32>, vector<10x16xf32>, vector<33x16xf32> -> vector<33x16xf32>
    %63 = arith.addf %58, %62 : vector<33x16xf32>
    %c0_37 = arith.constant 0 : index
    %c0_38 = arith.constant 0 : index
    %64 = vector.load %arg6[%c0_37, %c0_38] : memref<1x16xf32, #tpu.memory_space<vmem>>, vector<1x16xf32>
    %65 = vector.broadcast %64 : vector<1x16xf32> to vector<33x16xf32>
    %66 = arith.addf %63, %65 : vector<33x16xf32>
    %cst_39 = arith.constant 0.000000e+00 : f32
    %67 = vector.broadcast %cst_39 : f32 to vector<33x16xf32>
    %68 = arith.cmpf ogt, %66, %67 : vector<33x16xf32>
    %c0_40 = arith.constant 0 : index
    %c0_41 = arith.constant 0 : index
    %69 = vector.load %arg7[%c0_40, %c0_41] : memref<1x16xf32, #tpu.memory_space<vmem>>, vector<1x16xf32>
    %70 = vector.broadcast %69 : vector<1x16xf32> to vector<33x16xf32>
    %71 = arith.mulf %66, %70 : vector<33x16xf32>
    %72 = arith.select %68, %66, %71 : vector<33x16xi1>, vector<33x16xf32>
    %73 = vector.extract_strided_slice %72 {offsets = [0, 0], sizes = [17, 16], strides = [1, 1]} : vector<33x16xf32> to vector<17x16xf32>
    %c0_42 = arith.constant 0 : index
    %c0_43 = arith.constant 0 : index
    %c0_44 = arith.constant 0 : index
    %74 = vector.load %arg8[%c0_42, %c0_43, %c0_44] : memref<9x16x32xf32, #tpu.memory_space<vmem>>, vector<1x16x32xf32>
    %75 = vector.shape_cast %74 : vector<1x16x32xf32> to vector<16x32xf32>
    %cst_45 = arith.constant dense<0.000000e+00> : vector<17x32xf32>
    %76 = tpu.matmul %73, %75, %cst_45 {dimension_numbers = #tpu.dot_dimension_numbers<[1], [0], [0], [1], [0, 0, 1, 1], [], []>} : vector<17x16xf32>, vector<16x32xf32>, vector<17x32xf32> -> vector<17x32xf32>
    %77 = vector.extract_strided_slice %72 {offsets = [1, 0], sizes = [17, 16], strides = [1, 1]} : vector<33x16xf32> to vector<17x16xf32>
    %c1_46 = arith.constant 1 : index
    %c0_47 = arith.constant 0 : index
    %c0_48 = arith.constant 0 : index
    %78 = vector.load %arg8[%c1_46, %c0_47, %c0_48] : memref<9x16x32xf32, #tpu.memory_space<vmem>>, vector<1x16x32xf32>
    %79 = vector.shape_cast %78 : vector<1x16x32xf32> to vector<16x32xf32>
    %cst_49 = arith.constant dense<0.000000e+00> : vector<17x32xf32>
    %80 = tpu.matmul %77, %79, %cst_49 {dimension_numbers = #tpu.dot_dimension_numbers<[1], [0], [0], [1], [0, 0, 1, 1], [], []>} : vector<17x16xf32>, vector<16x32xf32>, vector<17x32xf32> -> vector<17x32xf32>
    %81 = arith.addf %76, %80 : vector<17x32xf32>
    %82 = vector.extract_strided_slice %72 {offsets = [2, 0], sizes = [17, 16], strides = [1, 1]} : vector<33x16xf32> to vector<17x16xf32>
    %c2_50 = arith.constant 2 : index
    %c0_51 = arith.constant 0 : index
    %c0_52 = arith.constant 0 : index
    %83 = vector.load %arg8[%c2_50, %c0_51, %c0_52] : memref<9x16x32xf32, #tpu.memory_space<vmem>>, vector<1x16x32xf32>
    %84 = vector.shape_cast %83 : vector<1x16x32xf32> to vector<16x32xf32>
    %cst_53 = arith.constant dense<0.000000e+00> : vector<17x32xf32>
    %85 = tpu.matmul %82, %84, %cst_53 {dimension_numbers = #tpu.dot_dimension_numbers<[1], [0], [0], [1], [0, 0, 1, 1], [], []>} : vector<17x16xf32>, vector<16x32xf32>, vector<17x32xf32> -> vector<17x32xf32>
    %86 = arith.addf %81, %85 : vector<17x32xf32>
    %87 = vector.extract_strided_slice %72 {offsets = [7, 0], sizes = [17, 16], strides = [1, 1]} : vector<33x16xf32> to vector<17x16xf32>
    %c3_54 = arith.constant 3 : index
    %c0_55 = arith.constant 0 : index
    %c0_56 = arith.constant 0 : index
    %88 = vector.load %arg8[%c3_54, %c0_55, %c0_56] : memref<9x16x32xf32, #tpu.memory_space<vmem>>, vector<1x16x32xf32>
    %89 = vector.shape_cast %88 : vector<1x16x32xf32> to vector<16x32xf32>
    %cst_57 = arith.constant dense<0.000000e+00> : vector<17x32xf32>
    %90 = tpu.matmul %87, %89, %cst_57 {dimension_numbers = #tpu.dot_dimension_numbers<[1], [0], [0], [1], [0, 0, 1, 1], [], []>} : vector<17x16xf32>, vector<16x32xf32>, vector<17x32xf32> -> vector<17x32xf32>
    %91 = arith.addf %86, %90 : vector<17x32xf32>
    %92 = vector.extract_strided_slice %72 {offsets = [8, 0], sizes = [17, 16], strides = [1, 1]} : vector<33x16xf32> to vector<17x16xf32>
    %c4_58 = arith.constant 4 : index
    %c0_59 = arith.constant 0 : index
    %c0_60 = arith.constant 0 : index
    %93 = vector.load %arg8[%c4_58, %c0_59, %c0_60] : memref<9x16x32xf32, #tpu.memory_space<vmem>>, vector<1x16x32xf32>
    %94 = vector.shape_cast %93 : vector<1x16x32xf32> to vector<16x32xf32>
    %cst_61 = arith.constant dense<0.000000e+00> : vector<17x32xf32>
    %95 = tpu.matmul %92, %94, %cst_61 {dimension_numbers = #tpu.dot_dimension_numbers<[1], [0], [0], [1], [0, 0, 1, 1], [], []>} : vector<17x16xf32>, vector<16x32xf32>, vector<17x32xf32> -> vector<17x32xf32>
    %96 = arith.addf %91, %95 : vector<17x32xf32>
    %97 = vector.extract_strided_slice %72 {offsets = [9, 0], sizes = [17, 16], strides = [1, 1]} : vector<33x16xf32> to vector<17x16xf32>
    %c5_62 = arith.constant 5 : index
    %c0_63 = arith.constant 0 : index
    %c0_64 = arith.constant 0 : index
    %98 = vector.load %arg8[%c5_62, %c0_63, %c0_64] : memref<9x16x32xf32, #tpu.memory_space<vmem>>, vector<1x16x32xf32>
    %99 = vector.shape_cast %98 : vector<1x16x32xf32> to vector<16x32xf32>
    %cst_65 = arith.constant dense<0.000000e+00> : vector<17x32xf32>
    %100 = tpu.matmul %97, %99, %cst_65 {dimension_numbers = #tpu.dot_dimension_numbers<[1], [0], [0], [1], [0, 0, 1, 1], [], []>} : vector<17x16xf32>, vector<16x32xf32>, vector<17x32xf32> -> vector<17x32xf32>
    %101 = arith.addf %96, %100 : vector<17x32xf32>
    %102 = vector.extract_strided_slice %72 {offsets = [14, 0], sizes = [17, 16], strides = [1, 1]} : vector<33x16xf32> to vector<17x16xf32>
    %c6_66 = arith.constant 6 : index
    %c0_67 = arith.constant 0 : index
    %c0_68 = arith.constant 0 : index
    %103 = vector.load %arg8[%c6_66, %c0_67, %c0_68] : memref<9x16x32xf32, #tpu.memory_space<vmem>>, vector<1x16x32xf32>
    %104 = vector.shape_cast %103 : vector<1x16x32xf32> to vector<16x32xf32>
    %cst_69 = arith.constant dense<0.000000e+00> : vector<17x32xf32>
    %105 = tpu.matmul %102, %104, %cst_69 {dimension_numbers = #tpu.dot_dimension_numbers<[1], [0], [0], [1], [0, 0, 1, 1], [], []>} : vector<17x16xf32>, vector<16x32xf32>, vector<17x32xf32> -> vector<17x32xf32>
    %106 = arith.addf %101, %105 : vector<17x32xf32>
    %107 = vector.extract_strided_slice %72 {offsets = [15, 0], sizes = [17, 16], strides = [1, 1]} : vector<33x16xf32> to vector<17x16xf32>
    %c7_70 = arith.constant 7 : index
    %c0_71 = arith.constant 0 : index
    %c0_72 = arith.constant 0 : index
    %108 = vector.load %arg8[%c7_70, %c0_71, %c0_72] : memref<9x16x32xf32, #tpu.memory_space<vmem>>, vector<1x16x32xf32>
    %109 = vector.shape_cast %108 : vector<1x16x32xf32> to vector<16x32xf32>
    %cst_73 = arith.constant dense<0.000000e+00> : vector<17x32xf32>
    %110 = tpu.matmul %107, %109, %cst_73 {dimension_numbers = #tpu.dot_dimension_numbers<[1], [0], [0], [1], [0, 0, 1, 1], [], []>} : vector<17x16xf32>, vector<16x32xf32>, vector<17x32xf32> -> vector<17x32xf32>
    %111 = arith.addf %106, %110 : vector<17x32xf32>
    %112 = vector.extract_strided_slice %72 {offsets = [16, 0], sizes = [17, 16], strides = [1, 1]} : vector<33x16xf32> to vector<17x16xf32>
    %c8_74 = arith.constant 8 : index
    %c0_75 = arith.constant 0 : index
    %c0_76 = arith.constant 0 : index
    %113 = vector.load %arg8[%c8_74, %c0_75, %c0_76] : memref<9x16x32xf32, #tpu.memory_space<vmem>>, vector<1x16x32xf32>
    %114 = vector.shape_cast %113 : vector<1x16x32xf32> to vector<16x32xf32>
    %cst_77 = arith.constant dense<0.000000e+00> : vector<17x32xf32>
    %115 = tpu.matmul %112, %114, %cst_77 {dimension_numbers = #tpu.dot_dimension_numbers<[1], [0], [0], [1], [0, 0, 1, 1], [], []>} : vector<17x16xf32>, vector<16x32xf32>, vector<17x32xf32> -> vector<17x32xf32>
    %116 = arith.addf %111, %115 : vector<17x32xf32>
    %c0_78 = arith.constant 0 : index
    %c0_79 = arith.constant 0 : index
    %117 = vector.load %arg9[%c0_78, %c0_79] : memref<1x32xf32, #tpu.memory_space<vmem>>, vector<1x32xf32>
    %118 = vector.broadcast %117 : vector<1x32xf32> to vector<17x32xf32>
    %119 = arith.addf %116, %118 : vector<17x32xf32>
    %cst_80 = arith.constant 0.000000e+00 : f32
    %120 = vector.broadcast %cst_80 : f32 to vector<17x32xf32>
    %121 = arith.cmpf ogt, %119, %120 : vector<17x32xf32>
    %c0_81 = arith.constant 0 : index
    %c0_82 = arith.constant 0 : index
    %122 = vector.load %arg10[%c0_81, %c0_82] : memref<1x32xf32, #tpu.memory_space<vmem>>, vector<1x32xf32>
    %123 = vector.broadcast %122 : vector<1x32xf32> to vector<17x32xf32>
    %124 = arith.mulf %119, %123 : vector<17x32xf32>
    %125 = arith.select %121, %119, %124 : vector<17x32xi1>, vector<17x32xf32>
    %c0_83 = arith.constant 0 : index
    %c0_84 = arith.constant 0 : index
    %126 = vector.load %arg11[%c0_83, %c0_84] : memref<32x6xf32, #tpu.memory_space<vmem>>, vector<32x6xf32>
    %cst_85 = arith.constant dense<0.000000e+00> : vector<17x6xf32>
    %127 = tpu.matmul %125, %126, %cst_85 {dimension_numbers = #tpu.dot_dimension_numbers<[1], [0], [0], [1], [0, 0, 1, 1], [], []>} : vector<17x32xf32>, vector<32x6xf32>, vector<17x6xf32> -> vector<17x6xf32>
    %c0_86 = arith.constant 0 : index
    %c0_87 = arith.constant 0 : index
    %128 = vector.load %arg12[%c0_86, %c0_87] : memref<1x6xf32, #tpu.memory_space<vmem>>, vector<1x6xf32>
    %129 = vector.broadcast %128 : vector<1x6xf32> to vector<17x6xf32>
    %130 = arith.addf %127, %129 : vector<17x6xf32>
    %131 = vector.extract_strided_slice %130 {offsets = [0, 1], sizes = [17, 1], strides = [1, 1]} : vector<17x6xf32> to vector<17x1xf32>
    %132 = vector.extract_strided_slice %130 {offsets = [0, 0], sizes = [17, 1], strides = [1, 1]} : vector<17x6xf32> to vector<17x1xf32>
    %133 = arith.subf %131, %132 : vector<17x1xf32>
    %cst_88 = arith.constant 0.000000e+00 : f32
    %134 = vector.broadcast %cst_88 : f32 to vector<17x1xf32>
    %135 = arith.subf %134, %133 : vector<17x1xf32>
    %136 = math.exp %135 : vector<17x1xf32>
    %cst_89 = arith.constant 1.000000e+00 : f32
    %137 = vector.broadcast %cst_89 : f32 to vector<17x1xf32>
    %138 = arith.addf %137, %136 : vector<17x1xf32>
    %cst_90 = arith.constant 1.000000e+00 : f32
    %139 = vector.broadcast %cst_90 : f32 to vector<17x1xf32>
    %140 = arith.divf %139, %138 : vector<17x1xf32>
    %141 = tpu.iota {dimensions = array<i32: 1>} : vector<17x6xi32>
    %c0_i32 = arith.constant 0 : i32
    %142 = vector.broadcast %c0_i32 : i32 to vector<17x6xi32>
    %143 = arith.cmpi eq, %141, %142 : vector<17x6xi32>
    %cst_91 = arith.constant 1.000000e+00 : f32
    %144 = vector.broadcast %cst_91 : f32 to vector<17x1xf32>
    %145 = arith.subf %144, %140 : vector<17x1xf32>
    %c1_i32 = arith.constant 1 : i32
    %146 = vector.broadcast %c1_i32 : i32 to vector<17x6xi32>
    %147 = arith.cmpi eq, %141, %146 : vector<17x6xi32>
    %148 = vector.shape_cast %140 : vector<17x1xf32> to vector<17x1xf32>
    %149 = vector.broadcast %148 : vector<17x1xf32> to vector<17x6xf32>
    %150 = arith.select %147, %149, %130 : vector<17x6xi1>, vector<17x6xf32>
    %151 = vector.shape_cast %145 : vector<17x1xf32> to vector<17x1xf32>
    %152 = vector.broadcast %151 : vector<17x1xf32> to vector<17x6xf32>
    %153 = arith.select %143, %152, %150 : vector<17x6xi1>, vector<17x6xf32>
    %c0_92 = arith.constant 0 : index
    %c0_93 = arith.constant 0 : index
    %c0_94 = arith.constant 0 : index
    %154 = vector.load %arg13[%c0_92, %c0_93, %c0_94] : memref<1x17x6xf32, #tpu.memory_space<vmem>>, vector<1x17x6xf32>
    %155 = vector.shape_cast %154 : vector<1x17x6xf32> to vector<17x6xf32>
    %156 = vector.shape_cast %153 : vector<17x6xf32> to vector<1x17x6xf32>
    tpu.vector_store %arg13[%c0_92, %c0_93, %c0_94], %156 {strides = array<i32>} : memref<1x17x6xf32, #tpu.memory_space<vmem>>, vector<1x17x6xf32>,
    return
  }
  func.func @transform_0(%arg0: i32) -> (i32, i32, i32) {
    %c0_i32 = arith.constant 0 : i32
    %c0_i32_0 = arith.constant 0 : i32
    %c0_i32_1 = arith.constant 0 : i32
    return %arg0, %c0_i32, %c0_i32_0 : i32, i32, i32
  }
  func.func @transform_1(%arg0: i32) -> (i32, i32) {
    %c0_i32 = arith.constant 0 : i32
    %c0_i32_0 = arith.constant 0 : i32
    %c0_i32_1 = arith.constant 0 : i32
    return %c0_i32, %c0_i32_0 : i32, i32
  }
  func.func @transform_2(%arg0: i32) -> (i32, i32) {
    %c0_i32 = arith.constant 0 : i32
    %c0_i32_0 = arith.constant 0 : i32
    %c0_i32_1 = arith.constant 0 : i32
    return %c0_i32, %c0_i32_0 : i32, i32
  }
  func.func @transform_3(%arg0: i32) -> (i32, i32) {
    %c0_i32 = arith.constant 0 : i32
    %c0_i32_0 = arith.constant 0 : i32
    %c0_i32_1 = arith.constant 0 : i32
    return %c0_i32, %c0_i32_0 : i32, i32
  }
  func.func @transform_4(%arg0: i32) -> (i32, i32, i32) {
    %c0_i32 = arith.constant 0 : i32
    %c0_i32_0 = arith.constant 0 : i32
    %c0_i32_1 = arith.constant 0 : i32
    %c0_i32_2 = arith.constant 0 : i32
    return %c0_i32, %c0_i32_0, %c0_i32_1 : i32, i32, i32
  }
  func.func @transform_5(%arg0: i32) -> (i32, i32) {
    %c0_i32 = arith.constant 0 : i32
    %c0_i32_0 = arith.constant 0 : i32
    %c0_i32_1 = arith.constant 0 : i32
    return %c0_i32, %c0_i32_0 : i32, i32
  }
  func.func @transform_6(%arg0: i32) -> (i32, i32) {
    %c0_i32 = arith.constant 0 : i32
    %c0_i32_0 = arith.constant 0 : i32
    %c0_i32_1 = arith.constant 0 : i32
    return %c0_i32, %c0_i32_0 : i32, i32
  }
  func.func @transform_7(%arg0: i32) -> (i32, i32, i32) {
    %c0_i32 = arith.constant 0 : i32
    %c0_i32_0 = arith.constant 0 : i32
    %c0_i32_1 = arith.constant 0 : i32
    %c0_i32_2 = arith.constant 0 : i32
    return %c0_i32, %c0_i32_0, %c0_i32_1 : i32, i32, i32
  }
  func.func @transform_8(%arg0: i32) -> (i32, i32) {
    %c0_i32 = arith.constant 0 : i32
    %c0_i32_0 = arith.constant 0 : i32
    %c0_i32_1 = arith.constant 0 : i32
    return %c0_i32, %c0_i32_0 : i32, i32
  }
  func.func @transform_9(%arg0: i32) -> (i32, i32) {
    %c0_i32 = arith.constant 0 : i32
    %c0_i32_0 = arith.constant 0 : i32
    %c0_i32_1 = arith.constant 0 : i32
    return %c0_i32, %c0_i32_0 : i32, i32
  }
  func.func @transform_10(%arg0: i32) -> (i32, i32) {
    %c0_i32 = arith.constant 0 : i32
    %c0_i32_0 = arith.constant 0 : i32
    %c0_i32_1 = arith.constant 0 : i32
    return %c0_i32, %c0_i32_0 : i32, i32
  }
  func.func @transform_11(%arg0: i32) -> (i32, i32) {
    %c0_i32 = arith.constant 0 : i32
    %c0_i32_0 = arith.constant 0 : i32
    %c0_i32_1 = arith.constant 0 : i32
    return %c0_i32, %c0_i32_0 : i32, i32
  }
  func.func @transform_12(%arg0: i32) -> (i32, i32, i32) {
    %c0_i32 = arith.constant 0 : i32
    %c0_i32_0 = arith.constant 0 : i32
    %c0_i32_1 = arith.constant 0 : i32
    return %arg0, %c0_i32, %c0_i32_0 : i32, i32, i32
  }
}

</mosaic_0001>

<bundles_post_ra>
// kernel: pnet_forward.1
= control target key start
LH: loop header
LB: loop body
LE: loop exit
PB: predicated region body
PF: predicated region fallthrough
CT: control target
= control target key end

     0   :  { %s3927_s21 = smov 0   ;;  %s4788_s0 = inlined_call_operand.vmem [shape: f32[2,196,27], index: 0, kind: input, shape index: {}]   ;;  %s4789_s1 = inlined_call_operand.vmem [shape: f32[27,10], index: 1, kind: input, shape index: {}]   ;;  %s4790_s2 = inlined_call_operand.vmem [shape: f32[1,10], index: 2, kind: input, shape index: {}]   ;;  %s4791_s3 = inlined_call_operand.vmem [shape: f32[1,10], index: 3, kind: input, shape index: {}]   ;;  %s4792_s4 = inlined_call_operand.vmem [shape: f32[9,10,16], index: 4, kind: input, shape index: {}]   ;;  %s4793_s5 = inlined_call_operand.vmem [shape: f32[1,16], index: 5, kind: input, shape index: {}]   ;;  %s4794_s6 = inlined_call_operand.vmem [shape: f32[1,16], index: 6, kind: input, shape index: {}]   ;;  %s4795_s7 = inlined_call_operand.vmem [shape: f32[9,16,32], index: 7, kind: input, shape index: {}]   ;;  %s4796_s8 = inlined_call_operand.vmem [shape: f32[1,32], index: 8, kind: input, shape index: {}]   ;;  %s4797_s9 = inlined_call_operand.vmem [shape: f32[1,32], index: 9, kind: input, shape index: {}]   ;;  %s4798_s10 = inlined_call_operand.vmem [shape: f32[32,6], index: 10, kind: input, shape index: {}]   ;;  %s4799_s11 = inlined_call_operand.vmem [shape: f32[1,6], index: 11, kind: input, shape index: {}]   ;;  %s4800_s12 = inlined_call_operand.vmem [shape: f32[2,17,6], index: 12, kind: output, shape index: {}]  }
   0x1 LB: > { %s3052_s22 = sadd.s32 4294967295, %s3854_s21   ;;  %p3056_p0 = scmp.ge.s32.totalorder %s3854_s21, 1  ;;  %s3854_s21 = sphi %s3927_s21, %s22_s21  }
   0x2   : > { %p362_p1 = scmp.lt.s32.totalorder %s3854_s21, 3 }
   0x4   : > { %p363_p2 = pnand %p3056_p0, %p362_p1 }
   0x5   : > { %v439_v0 = vld [vmem:[%s4789_s1] sm:$0xff] (!%p363_p2)  ;;  %v440_v1 = vld [vmem:[%s4789_s1 + $0x8] sm:$0xff] (!%p363_p2)  ;;  %v441_v2 = vld [vmem:[%s4789_s1 + $0x10] sm:$0xff] (!%p363_p2)  ;;  %vm526_vm0 = vcmask (!%p363_p2), 1042432   ;;  %v3856_v3 = vmov (!%p363_p2), 0.0|0.0   ;;  %p404_p3 = scmp.lt.s32.totalorder (!%p363_p2), %s3052_s22, 1 }
   0x6   : > { %366 = sbr.rel (%p363_p2) target bundleno = 1448 (0x5a8), region = 68  ;;  %3742 = vmatprep.subr.bf16.mxu0 (!%p363_p2), %v3856_v3  ;;  %v3743_v4 = vpack.c.bf16 (!%p363_p2), %v440_v1, %v439_v0  ;;  %v442_v5 = vld [vmem:[%s4789_s1 + $0x18] sm:$0x7] (!%p363_p2)  ;;  %3749 = vmatprep.subr.bf16.mxu1 (!%p363_p2), %v3856_v3  ;;  %vm3857_vm1 = vmmov (!%p363_p2), 0   ;;  %v3858_v6 = vmov (!%p363_p2), 0.0   ;;  %vm3859_vm2 = vmmov (!%p363_p2), 1  }
   0x7   : > { %3362 = vmatprep.mubr.msk.f32.mxu0 (!%p363_p2), %vm3857_vm1, %v3858_v6  ;;  %3441 = vmatprep.mubr.msk.f32.mxu1 (!%p363_p2), %vm3857_vm1, %v3858_v6  ;;  %v3746_v7 = vpack.c.bf16 (!%p363_p2), %v442_v5, %v441_v2  ;;  %vm3747_vm3 = vmpackc.low (!%p363_p2), %vm526_vm0, %vm3859_vm2  ;;  %vm450_vm4 = vcmask (!%p363_p2), 220160   ;;  %vm936_vm5 = vcmask (!%p363_p2), 1041408   ;;  %v3087_v34 = vld [vmem:[%s4792_s4 + $0x10] sm:$0xff] (!%p363_p2)  ;;  %v3088_v35 = vld [vmem:[%s4792_s4 + $0x18] sm:$0x3] (!%p363_p2)  ;;  %vm809_vm10 = vcmask (!%p363_p2), 1046528  }
   0x8   : > { %3744 = vmatpush3.bf16.msra.mxu0 (!%p363_p2), %v3743_v4  ;;  %vm4067_vm6 = vmpackc.low (!%p363_p2), %vm936_vm5, %vm3859_vm2  ;;  %v3750_v36 = vpack.c.bf16 (!%p363_p2), %v3088_v35, %v3087_v34  ;;  %v3133_v37 = vld [vmem:[%s4792_s4 + $0x60] sm:$0xff] (!%p363_p2)  ;;  %v3134_v38 = vld [vmem:[%s4792_s4 + $0x68] sm:$0x3] (!%p363_p2)  ;;  %s3860_s15 = smov (!%p363_p2), 1  }
   0x9   : > { %3745 = vmatprep.subr.bf16.mxu0 (!%p363_p2), %v3856_v3  ;;  %v3774_v39 = vpack.c.bf16 (!%p363_p2), %v3134_v38, %v3133_v37  ;;  %v4094_v52 = vld [vmem:[%s4790_s2] ss:$0 sm:$0xff] (!%p363_p2) }
   0xa   : > { %3752 = vmatpush3.bf16.msk.msra.mxu1 (!%p363_p2), %vm4067_vm6, %v3750_v36  ;;  %v4100_v56 = vld [vmem:[%s4791_s3] ss:$0 sm:$0xff] (!%p363_p2) }
   0xb   : > { %3753 = vmatprep.subr.bf16.mxu1 (!%p363_p2), %v3856_v3 }
   0xc   : > { %3748 = vmatpush3.bf16.msk.msra.mxu0 (!%p363_p2), %vm3747_vm3, %v3746_v7 }
   0xd   : > { %s4804_s22 = smov (!%p404_p3, %s3052_s22), 1  ;;  %3773 = vmatprep.subr.bf16.mxu0 %v3856_v3 }
   0xe   : > { %s3818_s13 = smul.u32 200, %s4804_s22 }
  0x10   : > { %s3962_s16 = scalar_lea.vmem %s4788_s0, %s3818_s13 }
  0x11   : > { %v414_v8 = vld [vmem:[%s3962_s16] sm:$0xff]  ;;  %v415_v9 = vld [vmem:[%s3962_s16 + $0x8] sm:$0xff]  ;;  %v416_v10 = vld [vmem:[%s3962_s16 + $0x10] sm:$0xff] }
  0x12   : > { %3363 = vmatmul.mubr.msk.f32.vlgmr.msra.gmra.mrb[0].mxu0 %vm450_vm4, %v414_v8  ;;  %v417_v11 = vld [vmem:[%s3962_s16 + $0x18] sm:$0xff]  ;;  %v418_v12 = vld [vmem:[%s3962_s16 + $0x20] sm:$0xff]  ;;  %v419_v13 = vld [vmem:[%s3962_s16 + $0x28] sm:$0xff] }
  0x13   : > { %3365 = vmatprep.mubr.msk.f32.mxu0 %vm3857_vm1, %v3858_v6  ;;  %v420_v14 = vld [vmem:[%s3962_s16 + $0x30] sm:$0xff]  ;;  %v421_v15 = vld [vmem:[%s3962_s16 + $0x38] sm:$0xff]  ;;  %v422_v16 = vld [vmem:[%s3962_s16 + $0x40] sm:$0xff]  ;;  %3776 = vmatpush3.bf16.msk.msra.mxu0 %vm4067_vm6, %v3774_v39 }
  0x14   : > { %v423_v17 = vld [vmem:[%s3962_s16 + $0x48] sm:$0xff]  ;;  %v424_v18 = vld [vmem:[%s3962_s16 + $0x50] sm:$0xff]  ;;  %v425_v19 = vld [vmem:[%s3962_s16 + $0x58] sm:$0xff]  ;;  %3781 = vmatprep.subr.bf16.mxu0 %v3856_v3 }
  0x15   : > { %v426_v20 = vld [vmem:[%s3962_s16 + $0x60] sm:$0xff]  ;;  %v427_v21 = vld [vmem:[%s3962_s16 + $0x68] sm:$0xff]  ;;  %v428_v22 = vld [vmem:[%s3962_s16 + $0x70] sm:$0xff] }
  0x16   : > { %3366 = vmatmul.mubr.msk.f32.gmra.mrb[2].mxu0 %vm450_vm4, %v415_v9  ;;  %v429_v23 = vld [vmem:[%s3962_s16 + $0x78] sm:$0xff]  ;;  %v430_v24 = vld [vmem:[%s3962_s16 + $0x80] sm:$0xff]  ;;  %v431_v25 = vld [vmem:[%s3962_s16 + $0x88] sm:$0xff] }
  0x17   : > { %3368 = vmatprep.mubr.msk.f32.mxu0 %vm3857_vm1, %v3858_v6  ;;  %v432_v26 = vld [vmem:[%s3962_s16 + $0x90] sm:$0xff]  ;;  %v433_v27 = vld [vmem:[%s3962_s16 + $0x98] sm:$0xff]  ;;  %v434_v28 = vld [vmem:[%s3962_s16 + $0xa0] sm:$0xff] }
  0x18   : > { %v435_v29 = vld [vmem:[%s3962_s16 + $0xa8] sm:$0xff]  ;;  %v436_v30 = vld [vmem:[%s3962_s16 + $0xb0] sm:$0xff]  ;;  %v437_v31 = vld [vmem:[%s3962_s16 + $0xb8] sm:$0xff] }
  0x19   : > { %v438_v32 = vld [vmem:[%s3962_s16 + $0xc0] sm:$0xf]  ;;  %s3819_s16 = smul.u32 24, %s4804_s22 }
  0x1a   : > { %3369 = vmatmul.mubr.msk.f32.gmra.mrb[4].mxu0 %vm450_vm4, %v416_v10 }
  0x1b   : > { %3371 = vmatprep.mubr.msk.f32.mxu0 %vm3857_vm1, %v3858_v6  ;;  %s413_s19 = scalar_lea.vmem %s4800_s12, %s3819_s16 }
  0x1e   : > { %3372 = vmatmul.mubr.msk.f32.gmra.mrb[6].mxu0 %vm450_vm4, %v417_v11 }
  0x1f   : > { %3374 = vmatprep.mubr.msk.f32.mxu0 %vm3857_vm1, %v3858_v6 }
  0x22   : > { %3375 = vmatmul.mubr.msk.f32.gmra.mrb[8].mxu0 %vm450_vm4, %v418_v12 }
  0x23   : > { %3377 = vmatprep.mubr.msk.f32.mxu0 %vm3857_vm1, %v3858_v6 }
  0x26   : > { %3378 = vmatmul.mubr.msk.f32.gmra.mrb[10].mxu0 %vm450_vm4, %v419_v13 }
  0x27   : > { %3380 = vmatprep.mubr.msk.f32.mxu0 %vm3857_vm1, %v3858_v6 }
  0x2a   : > { %3381 = vmatmul.mubr.msk.f32.gmra.mrb[12].mxu0 %vm450_vm4, %v420_v14 }
  0x2b   : > { %3383 = vmatprep.mubr.msk.f32.mxu0 %vm3857_vm1, %v3858_v6 }
  0x2e   : > { %3384 = vmatmul.mubr.msk.f32.gmra.mrb[14].mxu0 %vm450_vm4, %v421_v15 }
  0x2f   : > { %3386 = vmatprep.mubr.msk.f32.mxu0 %vm3857_vm1, %v3858_v6 }
  0x32   : > { %3387 = vmatmul.mubr.msk.f32.gmra.mrb[16].mxu0 %vm450_vm4, %v422_v16 }
  0x33   : > { %3389 = vmatprep.mubr.msk.f32.mxu0 %vm3857_vm1, %v3858_v6 }
  0x36   : > { %3390 = vmatmul.mubr.msk.f32.gmra.mrb[18].mxu0 %vm450_vm4, %v423_v17 }
  0x37   : > { %3392 = vmatprep.mubr.msk.f32.mxu0 %vm3857_vm1, %v3858_v6 }
  0x3a   : > { %3393 = vmatmul.mubr.msk.f32.gmra.mrb[20].mxu0 %vm450_vm4, %v424_v18 }
  0x3b   : > { %3395 = vmatprep.mubr.msk.f32.mxu0 %vm3857_vm1, %v3858_v6 }
  0x3e   : > { %3396 = vmatmul.mubr.msk.f32.gmra.mrb[22].mxu0 %vm450_vm4, %v425_v19 }
  0x3f   : > { %3398 = vmatprep.mubr.msk.f32.mxu0 %vm3857_vm1, %v3858_v6 }
  0x42   : > { %3399 = vmatmul.mubr.msk.f32.gmra.mrb[24].mxu0 %vm450_vm4, %v426_v20 }
  0x43   : > { %3401 = vmatprep.mubr.msk.f32.mxu0 %vm3857_vm1, %v3858_v6 }
  0x46   : > { %3402 = vmatmul.mubr.msk.f32.gmra.mrb[26].mxu0 %vm450_vm4, %v427_v21 }
  0x47   : > { %3404 = vmatprep.mubr.msk.f32.mxu0 %vm3857_vm1, %v3858_v6 }
  0x4a   : > { %3405 = vmatmul.mubr.msk.f32.gmra.mrb[28].mxu0 %vm450_vm4, %v428_v22 }
  0x4b   : > { %3407 = vmatprep.mubr.msk.f32.mxu0 %vm3857_vm1, %v3858_v6 }
  0x4e   : > { %3408 = vmatmul.mubr.msk.f32.gmra.mrb[30].mxu0 %vm450_vm4, %v429_v23 }
  0x4f   : > { %3410 = vmatprep.mubr.msk.f32.mxu0 %vm3857_vm1, %v3858_v6 }
  0x52   : > { %3411 = vmatmul.mubr.msk.f32.gmra.mrb[32].mxu0 %vm450_vm4, %v430_v24 }
  0x53   : > { %3413 = vmatprep.mubr.msk.f32.mxu0 %vm3857_vm1, %v3858_v6 }
  0x56   : > { %3414 = vmatmul.mubr.msk.f32.gmra.mrb[34].mxu0 %vm450_vm4, %v431_v25 }
  0x57   : > { %3416 = vmatprep.mubr.msk.f32.mxu0 %vm3857_vm1, %v3858_v6 }
  0x5a   : > { %3417 = vmatmul.mubr.msk.f32.gmra.mrb[36].mxu0 %vm450_vm4, %v432_v26 }
  0x5b   : > { %3419 = vmatprep.mubr.msk.f32.mxu0 %vm3857_vm1, %v3858_v6 }
  0x5e   : > { %3420 = vmatmul.mubr.msk.f32.gmra.mrb[38].mxu0 %vm450_vm4, %v433_v27 }
  0x5f   : > { %3422 = vmatprep.mubr.msk.f32.mxu0 %vm3857_vm1, %v3858_v6 }
  0x62   : > { %3423 = vmatmul.mubr.msk.f32.gmra.mrb[40].mxu0 %vm450_vm4, %v434_v28 }
  0x63   : > { %3425 = vmatprep.mubr.msk.f32.mxu0 %vm3857_vm1, %v3858_v6 }
  0x66   : > { %3426 = vmatmul.mubr.msk.f32.gmra.mrb[42].mxu0 %vm450_vm4, %v435_v29 }
  0x67   : > { %3428 = vmatprep.mubr.msk.f32.mxu0 %vm3857_vm1, %v3858_v6 }
  0x6a   : > { %3429 = vmatmul.mubr.msk.f32.gmra.mrb[44].mxu0 %vm450_vm4, %v436_v30 }
  0x6b   : > { %3431 = vmatprep.mubr.msk.f32.mxu0 %vm3857_vm1, %v3858_v6 }
  0x6e   : > { %3432 = vmatmul.mubr.msk.f32.gmra.mrb[46].mxu0 %vm450_vm4, %v437_v31 }
  0x6f   : > { %3434 = vmatprep.mubr.msk.f32.mxu0 %vm3857_vm1, %v3858_v6 }
  0x72   : > { %3435 = vmatmul.mubr.msk.f32.gmra.mrb[48].mxu0 %vm450_vm4, %v438_v32 }
  0x73   : > { %3555 = vmatprep.mubr.msk.f32.mxu0 %vm3857_vm1, %v3858_v6 }
  0xe5   : > { %v596_v40 = vpop.f32.mrb[0].mxu0 }
  0xe6   : > { %v3364_v41 = vpop.f32.mrb[1].mxu0  ;;  %v597_v58 = vadd.f32 %v4094_v52, %v596_v40 }
  0xe8   : > { %v752_v0 = vmul.f32 %v4100_v56, %v597_v58  ;;  %vm720_vm9 = vcmp.gt.f32.partialorder %v597_v58, 0.0 }
  0xe9   : > { %v601_v42 = vpop.f32.mrb[2].mxu0 }
  0xea   : > { %v3367_v43 = vpop.f32.mrb[3].mxu0  ;;  %v602_v1 = vadd.f32 %v4094_v52, %v601_v42  ;;  %v4113_v11 = vsel %vm720_vm9, %v597_v58, %v752_v0 }
  0xec   : > { %v753_v12 = vmul.f32 %v4100_v56, %v602_v1  ;;  %vm721_vm12 = vcmp.gt.f32.partialorder %v602_v1, 0.0 }
  0xed   : > { %v606_v44 = vpop.f32.mrb[4].mxu0 }
  0xee   : > { %v3370_v45 = vpop.f32.mrb[5].mxu0  ;;  %v607_v13 = vadd.f32 %v4094_v52, %v606_v44  ;;  %v4124_v22 = vsel %vm721_vm12, %v602_v1, %v753_v12 }
  0xf0   : > { %v754_v23 = vmul.f32 %v4100_v56, %v607_v13  ;;  %vm722_vm14 = vcmp.gt.f32.partialorder %v607_v13, 0.0 }
  0xf1   : > { %v611_v46 = vpop.f32.mrb[6].mxu0 }
  0xf2   : > { %v3373_v47 = vpop.f32.mrb[7].mxu0  ;;  %v612_v24 = vadd.f32 %v4094_v52, %v611_v46  ;;  %v4135_v34 = vsel %vm722_vm14, %v607_v13, %v754_v23 }
  0xf4   : > { %v755_v35 = vmul.f32 %v4100_v56, %v612_v24  ;;  %vm723_vm0 = vcmp.gt.f32.partialorder %v612_v24, 0.0 }
  0xf5   : > { %v616_v48 = vpop.f32.mrb[8].mxu0 }
  0xf6   : > { %v3376_v49 = vpop.f32.mrb[9].mxu0  ;;  %v617_v36 = vadd.f32 %v4094_v52, %v616_v48  ;;  %v4146_v45 = vsel %vm723_vm0, %v612_v24, %v755_v35 }
  0xf8   : > { %v756_v46 = vmul.f32 %v4100_v56, %v617_v36  ;;  %vm724_vm3 = vcmp.gt.f32.partialorder %v617_v36, 0.0 }
  0xf9   : > { %v4089_v50 = vpop.f32.mrb[10].mxu0 }
  0xfa   : > { %v3379_v51 = vpop.f32.mrb[11].mxu0  ;;  %v622_v47 = vadd.f32 %v4094_v52, %v4089_v50 }
  0xfc   : > { %v757_v50 = vmul.f32 %v4100_v56, %v622_v47 }
  0xfd   : > { %v626_v53 = vpop.f32.mrb[12].mxu0 }
  0xfe   : > { %v627_v54 = vadd.f32 %v4094_v52, %v626_v53  ;;  %v3382_v55 = vpop.f32.mrb[13].mxu0 }
 0x100   : > { %v758_v57 = vmul.f32 %v4100_v56, %v627_v54  ;;  %vm726_vm7 = vcmp.gt.f32.partialorder %v627_v54, 0.0 }
 0x101   : > { %v631_v59 = vpop.f32.mrb[14].mxu0 }
 0x102   : > { %v632_v60 = vadd.f32 %v4094_v52, %v631_v59  ;;  %v3385_v61 = vpop.f32.mrb[15].mxu0  ;;  %v4105_v62 = vsel %vm726_vm7, %v627_v54, %v758_v57  ;;  %v4158_v59 = vsel %vm724_vm3, %v617_v36, %v756_v46  ;;  %vm725_vm7 = vcmp.gt.f32.partialorder %v622_v47, 0.0 }
 0x103   : > { %v810_v8 = vrot.slane %v4105_v62, 1 }
 0x104   : > { %vm727_vm8 = vcmp.gt.f32.partialorder %v632_v60, 0.0  ;;  %v759_v63 = vmul.f32 %v4100_v56, %v632_v60 }
 0x105   : > { %v636_v2 = vpop.f32.mrb[16].mxu0 }
 0x106   : > { %v784_v4 = vsel %vm727_vm8, %v632_v60, %v759_v63  ;;  %v637_v5 = vadd.f32 %v4094_v52, %v636_v2  ;;  %v3388_v7 = vpop.f32.mrb[17].mxu0 }
 0x107   : > { %v811_v9 = vrot.slane %v784_v4, 1  ;;  %v4166_v4 = vsel %vm725_vm7, %v622_v47, %v757_v50  ;;  %vm925_vm7 = vcmask 80896  }
 0x108   : > { %vm728_vm11 = vcmp.gt.f32.partialorder %v637_v5, 0.0  ;;  %v760_v10 = vmul.f32 %v4100_v56, %v637_v5 }
 0x109   : > { %v4118_v14 = vsel %vm809_vm10, %v810_v8, %v811_v9  ;;  %v641_v15 = vpop.f32.mrb[18].mxu0 }
 0x10a   : > { %v830_v16 = vmax.f32 %v4113_v11, %v4118_v14  ;;  %v785_v17 = vsel %vm728_vm11, %v637_v5, %v760_v10  ;;  %v642_v18 = vadd.f32 %v4094_v52, %v641_v15  ;;  %v3391_v19 = vpop.f32.mrb[19].mxu0 }
 0x10b   : > { %v813_v20 = vrot.slane %v785_v17, 1 }
 0x10c   : > { %vm729_vm13 = vcmp.gt.f32.partialorder %v642_v18, 0.0  ;;  %v761_v21 = vmul.f32 %v4100_v56, %v642_v18 }
 0x10d   : > { %v4129_v25 = vsel %vm809_vm10, %v811_v9, %v813_v20  ;;  %v646_v26 = vpop.f32.mrb[20].mxu0 }
 0x10e   : > { %v831_v27 = vmax.f32 %v4124_v22, %v4129_v25  ;;  %v786_v28 = vsel %vm729_vm13, %v642_v18, %v761_v21  ;;  %v647_v29 = vadd.f32 %v4094_v52, %v646_v26  ;;  %v3394_v30 = vpop.f32.mrb[21].mxu0 }
 0x10f   : > { %v815_v31 = vrot.slane %v786_v28, 1 }
 0x110   : > { %vm730_vm15 = vcmp.gt.f32.partialorder %v647_v29, 0.0  ;;  %v762_v32 = vmul.f32 %v4100_v56, %v647_v29 }
 0x111   : > { %v4140_v37 = vsel %vm809_vm10, %v813_v20, %v815_v31  ;;  %v651_v38 = vpop.f32.mrb[22].mxu0 }
 0x112   : > { %v832_v39 = vmax.f32 %v4135_v34, %v4140_v37  ;;  %v787_v40 = vsel %vm730_vm15, %v647_v29, %v762_v32  ;;  %v652_v41 = vadd.f32 %v4094_v52, %v651_v38  ;;  %v3397_v42 = vpop.f32.mrb[23].mxu0  ;;  %vm878_vm15 = vcmask 1045504  }
 0x113   : > { %v817_v43 = vrot.slane %v787_v40, 1 }
 0x114   : > { %vm731_vm2 = vcmp.gt.f32.partialorder %v652_v41, 0.0  ;;  %v763_v44 = vmul.f32 %v4100_v56, %v652_v41 }
 0x115   : > { %v4152_v48 = vsel %vm809_vm10, %v815_v31, %v817_v43  ;;  %v656_v49 = vpop.f32.mrb[24].mxu0 }
 0x116   : > { %v833_v51 = vmax.f32 %v4146_v45, %v4152_v48  ;;  %v788_v53 = vsel %vm731_vm2, %v652_v41, %v763_v44  ;;  %v657_v54 = vadd.f32 %v4094_v52, %v656_v49  ;;  %v3400_v55 = vpop.f32.mrb[25].mxu0 }
 0x117   : > { %v819_v57 = vrot.slane %v788_v53, 1 }
 0x118   : > { %vm732_vm4 = vcmp.gt.f32.partialorder %v657_v54, 0.0  ;;  %v764_v58 = vmul.f32 %v4100_v56, %v657_v54 }
 0x119   : > { %v4162_v60 = vsel %vm809_vm10, %v817_v43, %v819_v57  ;;  %v661_v61 = vpop.f32.mrb[26].mxu0 }
 0x11a   : > { %v834_v63 = vmax.f32 %v4158_v59, %v4162_v60  ;;  %v789_v0 = vsel %vm732_vm4, %v657_v54, %v764_v58  ;;  %v3403_v1 = vpop.f32.mrb[27].mxu0  ;;  %v662_v31 = vadd.f32 %v4094_v52, %v661_v61 }
 0x11b   : > { %v821_v2 = vrot.slane %v789_v0, 1 }
 0x11c   : > { %v765_v43 = vmul.f32 %v4100_v56, %v662_v31  ;;  %vm733_vm12 = vcmp.gt.f32.partialorder %v662_v31, 0.0 }
 0x11d   : > { %v4169_v5 = vsel %vm809_vm10, %v819_v57, %v821_v2  ;;  %v4172_v7 = vmax.f32 %v4105_v62, %v821_v2  ;;  %v666_v8 = vpop.f32.mrb[28].mxu0 }
 0x11e   : > { %v835_v9 = vmax.f32 %v4166_v4, %v4169_v5  ;;  %v3406_v10 = vpop.f32.mrb[29].mxu0  ;;  %v667_v44 = vadd.f32 %v4094_v52, %v666_v8  ;;  %v790_v50 = vsel %vm733_vm12, %v662_v31, %v765_v43 }
 0x120   : > { %v766_v61 = vmul.f32 %v4100_v56, %v667_v44  ;;  %vm734_vm14 = vcmp.gt.f32.partialorder %v667_v44, 0.0 }
 0x121   : > { %v671_v12 = vpop.f32.mrb[30].mxu0 }
 0x122   : > { %v3409_v13 = vpop.f32.mrb[31].mxu0  ;;  %v672_v1 = vadd.f32 %v4094_v52, %v671_v12 }
 0x124   : > { %vm735_vm2 = vcmp.gt.f32.partialorder %v672_v1, 0.0  ;;  %v767_v12 = vmul.f32 %v4100_v56, %v672_v1 }
 0x125   : > { %v676_v15 = vpop.f32.mrb[32].mxu0 }
 0x126   : > { %v3412_v17 = vpop.f32.mrb[33].mxu0 }
 0x129   : > { %v4176_v18 = vpop.f32.mrb[34].mxu0 }
 0x12a   : > { %v3415_v19 = vpop.f32.mrb[35].mxu0 }
 0x12b   : > { %v677_v19 = vadd.f32 %v4094_v52, %v676_v15 }
 0x12d   : > { %v686_v20 = vpop.f32.mrb[36].mxu0  ;;  %vm736_vm3 = vcmp.gt.f32.partialorder %v677_v19, 0.0 }
 0x12e   : > { %v687_v21 = vadd.f32 %v4094_v52, %v686_v20  ;;  %v3418_v23 = vpop.f32.mrb[37].mxu0 }
 0x130   : > { %v770_v24 = vmul.f32 %v4100_v56, %v687_v21  ;;  %vm738_vm8 = vcmp.gt.f32.partialorder %v687_v21, 0.0 }
 0x131   : > { %v691_v62 = vpop.f32.mrb[38].mxu0 }
 0x132   : > { %v692_v26 = vadd.f32 %v4094_v52, %v691_v62  ;;  %v3421_v28 = vpop.f32.mrb[39].mxu0  ;;  %v4181_v29 = vsel %vm738_vm8, %v687_v21, %v770_v24  ;;  %v791_v62 = vsel %vm734_vm14, %v667_v44, %v766_v61  ;;  %v906_v44 = vld [vmem:[%s4792_s4] sm:$0xff] }
 0x133   : > { %v844_v40 = vrot.slane %v4181_v29, 1 }
 0x134   : > { %vm739_vm9 = vcmp.gt.f32.partialorder %v692_v26, 0.0  ;;  %v771_v30 = vmul.f32 %v4100_v56, %v692_v26 }
 0x135   : > { %v696_v32 = vpop.f32.mrb[40].mxu0 }
 0x136   : > { %v796_v35 = vsel %vm739_vm9, %v692_v26, %v771_v30  ;;  %v697_v36 = vadd.f32 %v4094_v52, %v696_v32  ;;  %v3424_v38 = vpop.f32.mrb[41].mxu0 }
 0x137   : > { %v845_v41 = vrot.slane %v796_v35, 1 }
 0x138   : > { %vm740_vm11 = vcmp.gt.f32.partialorder %v697_v36, 0.0  ;;  %v772_v42 = vmul.f32 %v4100_v56, %v697_v36 }
 0x139   : > { %v846_v46 = vsel %vm809_vm10, %v844_v40, %v845_v41  ;;  %v701_v47 = vpop.f32.mrb[42].mxu0 }
 0x13a   : > { %v864_v49 = vmax.f32 %v789_v0, %v846_v46  ;;  %v797_v53 = vsel %vm740_vm11, %v697_v36, %v772_v42  ;;  %v702_v54 = vadd.f32 %v4094_v52, %v701_v47  ;;  %v3427_v55 = vpop.f32.mrb[43].mxu0  ;;  %v768_v36 = vmul.f32 %v4100_v56, %v677_v19  ;;  %v907_v46 = vld [vmem:[%s4792_s4 + $0x8] sm:$0x3] }
 0x13b   : > { %v847_v57 = vrot.slane %v797_v53, 1  ;;  %v792_v47 = vsel %vm735_vm2, %v672_v1, %v767_v12  ;;  %vm1256_vm11 = vcmask 1040384  }
 0x13c   : > { %vm741_vm13 = vcmp.gt.f32.partialorder %v702_v54, 0.0  ;;  %v773_v58 = vmul.f32 %v4100_v56, %v702_v54  ;;  %v879_v21 = vrot.slane %v864_v49, 2  ;;  %v793_v55 = vsel %vm736_vm3, %v677_v19, %v768_v36  ;;  %v3150_v19 = vld [vmem:[%s4792_s4 + $0x88] sm:$0x3] }
 0x13d   : > { %v848_v2 = vsel %vm809_vm10, %v845_v41, %v847_v57  ;;  %v706_v8 = vpop.f32.mrb[44].mxu0  ;;  %v682_v41 = vadd.f32 %v4094_v52, %v4176_v18 }
 0x13e   : > { %v865_v10 = vmax.f32 %v790_v50, %v848_v2  ;;  %v798_v13 = vsel %vm741_vm13, %v702_v54, %v773_v58  ;;  %v707_v0 = vadd.f32 %v4094_v52, %v706_v8  ;;  %v3430_v17 = vpop.f32.mrb[45].mxu0  ;;  %v3754_v50 = vpack.c.bf16 %v907_v46, %v906_v44  ;;  %v3109_v46 = vld [vmem:[%s4792_s4 + $0x30] sm:$0xff] }
 0x13f   : > { %v849_v20 = vrot.slane %v798_v13, 1  ;;  %v769_v61 = vmul.f32 %v4100_v56, %v682_v41  ;;  %vm737_vm9 = vcmp.gt.f32.partialorder %v682_v41, 0.0 }
 0x140   : > { %v880_v23 = vrot.slane %v865_v10, 2  ;;  %vm742_vm0 = vcmp.gt.f32.partialorder %v707_v0, 0.0  ;;  %v774_v24 = vmul.f32 %v4100_v56, %v707_v0 }
 0x141   : > { %v850_v26 = vsel %vm809_vm10, %v847_v57, %v849_v20  ;;  %v711_v28 = vpop.f32.mrb[46].mxu0 }
 0x142   : > { %v881_v30 = vsel %vm878_vm15, %v879_v21, %v880_v23  ;;  %v866_v31 = vmax.f32 %v791_v62, %v850_v26  ;;  %v799_v32 = vsel %vm742_vm0, %v707_v0, %v774_v24  ;;  %v712_v15 = vadd.f32 %v4094_v52, %v711_v28  ;;  %v3433_v35 = vpop.f32.mrb[47].mxu0 }
 0x143   : > { %v851_v38 = vrot.slane %v799_v32, 1  ;;  %v4207_v40 = vmax.f32 %v830_v16, %v881_v30 }
 0x144   : > { %v882_v42 = vrot.slane %v866_v31, 2  ;;  %vm743_vm4 = vcmp.gt.f32.partialorder %v712_v15, 0.0  ;;  %v775_v43 = vmul.f32 %v4100_v56, %v712_v15 }
 0x145   : > { %v852_v11 = vsel %vm809_vm10, %v849_v20, %v851_v38  ;;  %v716_v14 = vpop.f32.mrb[48].mxu0  ;;  %v794_v20 = vsel %vm737_vm9, %v682_v41, %v769_v61  ;;  %v3117_v61 = vld [vmem:[%s4792_s4 + $0x40] sm:$0xff] }
 0x146   : > { %v883_v16 = vsel %vm878_vm15, %v880_v23, %v882_v42  ;;  %v867_v18 = vmax.f32 %v792_v47, %v852_v11  ;;  %v800_v49 = vsel %vm743_vm4, %v712_v15, %v775_v43  ;;  %v717_v53 = vadd.f32 %v4094_v52, %v716_v14  ;;  %v3436_v54 = vpop.f32.mrb[49].mxu0  ;;  %v3110_v47 = vld [vmem:[%s4792_s4 + $0x38] sm:$0x3] }
 0x147   : > { %v4226_v57 = vmax.f32 %v831_v27, %v883_v16  ;;  %v853_v58 = vrot.slane %v800_v49, 1  ;;  %v916_v52 = vrot.slane %v4207_v40, 1  ;;  %v1136_v14 = vrot.slane %v4207_v40, 2 }
 0x148   : > { %v884_v1 = vrot.slane %v867_v18, 2  ;;  %vm744_vm8 = vcmp.gt.f32.partialorder %v717_v53, 0.0  ;;  %v776_v2 = vmul.f32 %v4100_v56, %v717_v53  ;;  %v3149_v56 = vld [vmem:[%s4792_s4 + $0x80] sm:$0xff]  ;;  %v3762_v16 = vpack.c.bf16 %v3110_v47, %v3109_v46 }
 0x149   : > { %v854_v8 = vsel %vm809_vm10, %v851_v38, %v853_v58  ;;  %v917_v10 = vrot.slane %v4226_v57, 1  ;;  %v1588_v23 = vrot.slane %v4226_v57, 6  ;;  %v3782_v26 = vpack.c.bf16 %v3150_v19, %v3149_v56  ;;  %v3125_v56 = vld [vmem:[%s4792_s4 + $0x50] sm:$0xff]  ;;  %v3126_v19 = vld [vmem:[%s4792_s4 + $0x58] sm:$0x3] }
 0x14a   : > { %v885_v13 = vsel %vm878_vm15, %v882_v42, %v884_v1  ;;  %v868_v22 = vmax.f32 %v793_v55, %v854_v8  ;;  %v801_v25 = vsel %vm744_vm8, %v717_v53, %v776_v2  ;;  %v3102_v42 = vld [vmem:[%s4792_s4 + $0x28] sm:$0x3]  ;;  %v1137_v11 = vrot.slane %v4226_v57, 2 }
 0x14b   : > { %v4237_v27 = vmax.f32 %v832_v39, %v885_v13  ;;  %v855_v0 = vrot.slane %v801_v25, 1  ;;  %v918_v17 = vsel %vm809_vm10, %v916_v52, %v917_v10  ;;  %v1258_v2 = vrot.slane %v4226_v57, 7 }
 0x14c   : > { %v886_v21 = vrot.slane %v868_v22, 2  ;;  %3442 = vmatmul.mubr.msk.f32.vlgmr.msra.gmra.mrb[0].mxu1 %vm925_vm7, %v918_v17  ;;  %v1138_v18 = vsel %vm878_vm15, %v1136_v14, %v1137_v11  ;;  %v1257_v8 = vrot.slane %v4207_v40, 7  ;;  %vm2995_vm8 = vcmask 40960  }
 0x14d   : > { %v856_v34 = vsel %vm809_vm10, %v853_v58, %v855_v0  ;;  %v870_v37 = vmax.f32 %v4181_v29, %v855_v0  ;;  %3756 = vmatpush3.bf16.msk.msra.mxu1 %vm4067_vm6, %v3754_v50  ;;  %3444 = vmatprep.mubr.msk.f32.mxu1 %vm3857_vm1, %v3858_v6  ;;  %v919_v39 = vrot.slane %v4237_v27, 1  ;;  %v1589_v24 = vrot.slane %v4237_v27, 6 }
 0x14e   : > { %v887_v62 = vsel %vm878_vm15, %v884_v1, %v886_v21  ;;  %v869_v12 = vmax.f32 %v794_v20, %v856_v34  ;;  %3757 = vmatprep.subr.bf16.mxu1 %v3856_v3  ;;  %v1139_v49 = vrot.slane %v4237_v27, 2  ;;  %v3118_v1 = vld [vmem:[%s4792_s4 + $0x48] sm:$0x3]  ;;  %v1260_v13 = vrot.slane %v4237_v27, 7 }
 0x14f   : > { %v4261_v29 = vmax.f32 %v833_v51, %v887_v62  ;;  %v890_v28 = vrot.slane %v870_v37, 2  ;;  %v4264_v30 = vsel %vm809_vm10, %v917_v10, %v919_v39  ;;  %v1590_v31 = vsel %vm936_vm5, %v1588_v23, %v1589_v24 }
 0x150   : > { %v888_v32 = vrot.slane %v869_v12, 2  ;;  %3445 = vmatmul.mubr.msk.f32.gmra.mrb[2].mxu1 %vm925_vm7, %v4264_v30  ;;  %3556 = vmatmul.mubr.msk.f32.vlgmr.msra.gmra.mrb[50].mxu0 %vm925_vm7, %v1590_v31  ;;  %v1140_v53 = vsel %vm878_vm15, %v1137_v11, %v1139_v49  ;;  %v3766_v52 = vpack.c.bf16 %v3118_v1, %v3117_v61  ;;  %v1259_v10 = vsel %vm1256_vm11, %v1257_v8, %v1258_v2  ;;  %v1950_v12 = vld [vmem:[%s4795_s7] sm:$0xff] }
 0x151   : > { %3447 = vmatprep.mubr.msk.f32.mxu1 %vm3857_vm1, %v3858_v6  ;;  %3558 = vmatprep.mubr.msk.f32.mxu0 %vm3857_vm1, %v3858_v6  ;;  %v921_v45 = vrot.slane %v4261_v29, 1  ;;  %v1591_v48 = vrot.slane %v4261_v29, 6  ;;  %v905_v51 = vmax.f32 %v4172_v7, %v890_v28  ;;  %v1141_v54 = vrot.slane %v4261_v29, 2 }
 0x152   : > { %v889_v15 = vsel %vm878_vm15, %v886_v21, %v888_v32  ;;  %v891_v35 = vsel %vm878_vm15, %v888_v32, %v890_v28  ;;  %3784 = vmatpush3.bf16.msk.msra.mxu0 %vm4067_vm6, %v3782_v26  ;;  %v1261_v22 = vsel %vm1256_vm11, %v1258_v2, %v1260_v13  ;;  %v1262_v25 = vrot.slane %v4261_v29, 7  ;;  %v1951_v26 = vld [vmem:[%s4795_s7 + $0x8] sm:$0xff] }
 0x153   : > { %v4284_v36 = vmax.f32 %v834_v63, %v889_v15  ;;  %v4289_v38 = vmax.f32 %v835_v9, %v891_v35  ;;  %v4292_v41 = vsel %vm809_vm10, %v919_v39, %v921_v45  ;;  %v1592_v7 = vsel %vm936_vm5, %v1589_v24, %v1591_v48  ;;  %3788 = vmatprep.subr.bf16.mxu0 %v3856_v3  ;;  %v3101_v9 = vld [vmem:[%s4792_s4 + $0x20] sm:$0xff]  ;;  %v3159_v39 = vld [vmem:[%s4795_s7 + $0x10] sm:$0xff]  ;;  %v3160_v24 = vld [vmem:[%s4795_s7 + $0x18] sm:$0xff] }
 0x154   : > { %3448 = vmatmul.mubr.msk.f32.gmra.mrb[4].mxu1 %vm925_vm7, %v4292_v41  ;;  %3559 = vmatmul.mubr.msk.f32.gmra.mrb[52].mxu0 %vm925_vm7, %v1592_v7  ;;  %v3758_v44 = vpack.c.bf16 %v3102_v42, %v3101_v9  ;;  %v1142_v55 = vsel %vm878_vm15, %v1139_v49, %v1141_v54  ;;  %v3770_v20 = vpack.c.bf16 %v3126_v19, %v3125_v56 }
 0x155   : > { %3450 = vmatprep.mubr.msk.f32.mxu1 %vm3857_vm1, %v3858_v6  ;;  %3561 = vmatprep.mubr.msk.f32.mxu0 %vm3857_vm1, %v3858_v6  ;;  %v4304_v59 = vrot.slane %v4284_v36, 1  ;;  %v1593_v60 = vrot.slane %v4284_v36, 6  ;;  %v1595_v5 = vrot.slane %v4289_v38, 6  ;;  %v1143_v58 = vrot.slane %v4284_v36, 2 }
 0x156   : > { %v1264_v0 = vrot.slane %v4284_v36, 7  ;;  %v1481_v23 = vrot.slane %v4289_v38, 1  ;;  %v1708_v34 = vrot.slane %v4289_v38, 7  ;;  %v3786_v62 = vpack.c.bf16 %v3160_v24, %v3159_v39 }
 0x157   : > { %v4309_v63 = vsel %vm809_vm10, %v921_v45, %v4304_v59  ;;  %v1594_v4 = vsel %vm936_vm5, %v1591_v48, %v1593_v60  ;;  %v1596_v43 = vsel %vm936_vm5, %v1593_v60, %v1595_v5  ;;  %v1144_v50 = vsel %vm878_vm15, %v1141_v54, %v1143_v58 }
 0x158   : > { %3451 = vmatmul.mubr.msk.f32.gmra.mrb[6].mxu1 %vm925_vm7, %v4309_v63  ;;  %3562 = vmatmul.mubr.msk.f32.gmra.mrb[54].mxu0 %vm925_vm7, %v1594_v4  ;;  %v1265_v17 = vsel %vm1256_vm11, %v1262_v25, %v1264_v0  ;;  %v1482_v33 = vsel %vm809_vm10, %v4304_v59, %v1481_v23  ;;  %v1709_v37 = vsel %vm1256_vm11, %v1264_v0, %v1708_v34 }
 0x159   : > { %3453 = vmatprep.mubr.msk.f32.mxu1 %vm3857_vm1, %v3858_v6  ;;  %3564 = vmatprep.mubr.msk.f32.mxu0 %vm3857_vm1, %v3858_v6 }
 0x15c   : > { %3454 = vmatmul.mubr.msk.f32.gmra.mrb[8].mxu1 %vm925_vm7, %v4304_v59  ;;  %3565 = vmatmul.mubr.msk.f32.gmra.mrb[56].mxu0 %vm925_vm7, %v1596_v43 }
 0x15d   : > { %3460 = vmatprep.mubr.msk.f32.mxu1 %vm3857_vm1, %v3858_v6  ;;  %3567 = vmatprep.mubr.msk.f32.mxu0 %vm3857_vm1, %v3858_v6 }
 0x160   : > { %3461 = vmatmul.mubr.msk.f32.vlgmr.msra.gmra.mrb[10].mxu1 %vm925_vm7, %v4207_v40  ;;  %3568 = vmatmul.mubr.msk.f32.gmra.mrb[58].mxu0 %vm925_vm7, %v1595_v5  ;;  %v1263_v40 = vsel %vm1256_vm11, %v1260_v13, %v1262_v25 }
 0x161   : > { %3760 = vmatpush3.bf16.msk.msra.mxu1 %vm4067_vm6, %v3758_v44  ;;  %3463 = vmatprep.mubr.msk.f32.mxu1 %vm3857_vm1, %v3858_v6 }
 0x162   : > { %3593 = vmatprep.mubr.msk.f32.mxu0 %vm3857_vm1, %v3858_v6  ;;  %3761 = vmatprep.subr.bf16.mxu1 %v3856_v3 }
 0x164   : > { %3464 = vmatmul.mubr.msk.f32.gmra.mrb[12].mxu1 %vm925_vm7, %v4226_v57  ;;  %3594 = vmatmul.mubr.msk.f32.vlgmr.msra.gmra.mrb[60].mxu0 %vm925_vm7, %v4237_v27 }
 0x165   : > { %3466 = vmatprep.mubr.msk.f32.mxu1 %vm3857_vm1, %v3858_v6  ;;  %3596 = vmatprep.mubr.msk.f32.mxu0 %vm3857_vm1, %v3858_v6 }
 0x168   : > { %3467 = vmatmul.mubr.msk.f32.gmra.mrb[14].mxu1 %vm925_vm7, %v4237_v27  ;;  %3597 = vmatmul.mubr.msk.f32.gmra.mrb[62].mxu0 %vm925_vm7, %v4261_v29 }
 0x169   : > { %3469 = vmatprep.mubr.msk.f32.mxu1 %vm3857_vm1, %v3858_v6  ;;  %3599 = vmatprep.mubr.msk.f32.mxu0 %vm3857_vm1, %v3858_v6 }
 0x16c   : > { %3470 = vmatmul.mubr.msk.f32.gmra.mrb[16].mxu1 %vm925_vm7, %v4261_v29  ;;  %3600 = vmatmul.mubr.msk.f32.gmra.mrb[64].mxu0 %vm925_vm7, %v4284_v36 }
 0x16d   : > { %3472 = vmatprep.mubr.msk.f32.mxu1 %vm3857_vm1, %v3858_v6  ;;  %3602 = vmatprep.mubr.msk.f32.mxu0 %vm3857_vm1, %v3858_v6 }
 0x170   : > { %3473 = vmatmul.mubr.msk.f32.gmra.mrb[18].mxu1 %vm925_vm7, %v4284_v36  ;;  %3603 = vmatmul.mubr.msk.f32.gmra.mrb[66].mxu0 %vm925_vm7, %v4289_v38 }
 0x171   : > { %3479 = vmatprep.mubr.msk.f32.mxu1 %vm3857_vm1, %v3858_v6  ;;  %3605 = vmatprep.mubr.msk.f32.mxu0 %vm3857_vm1, %v3858_v6 }
 0x174   : > { %3480 = vmatmul.mubr.msk.f32.vlgmr.msra.gmra.mrb[20].mxu1 %vm925_vm7, %v1138_v18  ;;  %3606 = vmatmul.mubr.msk.f32.gmra.mrb[68].mxu0 %vm925_vm7, %v905_v51 }
 0x175   : > { %3764 = vmatpush3.bf16.msk.msra.mxu1 %vm4067_vm6, %v3762_v16  ;;  %3482 = vmatprep.mubr.msk.f32.mxu1 %vm3857_vm1, %v3858_v6 }
 0x176   : > { %3765 = vmatprep.subr.bf16.mxu1 %v3856_v3  ;;  %3625 = vmatprep.mubr.msk.f32.mxu0 %vm3857_vm1, %v3858_v6 }
 0x178   : > { %3483 = vmatmul.mubr.msk.f32.gmra.mrb[22].mxu1 %vm925_vm7, %v1140_v53 }
 0x179   : > { %3485 = vmatprep.mubr.msk.f32.mxu1 %vm3857_vm1, %v3858_v6 }
 0x17c   : > { %3486 = vmatmul.mubr.msk.f32.gmra.mrb[24].mxu1 %vm925_vm7, %v1142_v55 }
 0x17d   : > { %3488 = vmatprep.mubr.msk.f32.mxu1 %vm3857_vm1, %v3858_v6 }
 0x180   : > { %3489 = vmatmul.mubr.msk.f32.gmra.mrb[26].mxu1 %vm925_vm7, %v1144_v50 }
 0x181   : > { %3491 = vmatprep.mubr.msk.f32.mxu1 %vm3857_vm1, %v3858_v6 }
 0x184   : > { %3492 = vmatmul.mubr.msk.f32.gmra.mrb[28].mxu1 %vm925_vm7, %v1143_v58 }
 0x185   : > { %3498 = vmatprep.mubr.msk.f32.mxu1 %vm3857_vm1, %v3858_v6 }
 0x188   : > { %3499 = vmatmul.mubr.msk.f32.vlgmr.msra.gmra.mrb[30].mxu1 %vm925_vm7, %v1259_v10 }
 0x189   : > { %3768 = vmatpush3.bf16.msk.msra.mxu1 %vm4067_vm6, %v3766_v52  ;;  %3501 = vmatprep.mubr.msk.f32.mxu1 %vm3857_vm1, %v3858_v6 }
 0x18a   : > { %3769 = vmatprep.subr.bf16.mxu1 %v3856_v3 }
 0x18c   : > { %3502 = vmatmul.mubr.msk.f32.gmra.mrb[32].mxu1 %vm925_vm7, %v1261_v22 }
 0x18d   : > { %3504 = vmatprep.mubr.msk.f32.mxu1 %vm3857_vm1, %v3858_v6 }
 0x190   : > { %3505 = vmatmul.mubr.msk.f32.gmra.mrb[34].mxu1 %vm925_vm7, %v1263_v40 }
 0x191   : > { %3507 = vmatprep.mubr.msk.f32.mxu1 %vm3857_vm1, %v3858_v6 }
 0x194   : > { %3508 = vmatmul.mubr.msk.f32.gmra.mrb[36].mxu1 %vm925_vm7, %v1265_v17 }
 0x195   : > { %3510 = vmatprep.mubr.msk.f32.mxu1 %vm3857_vm1, %v3858_v6 }
 0x198   : > { %3511 = vmatmul.mubr.msk.f32.gmra.mrb[38].mxu1 %vm925_vm7, %v1264_v0 }
 0x199   : > { %3517 = vmatprep.mubr.msk.f32.mxu1 %vm3857_vm1, %v3858_v6 }
 0x19c   : > { %3518 = vmatmul.mubr.msk.f32.vlgmr.msra.gmra.mrb[40].mxu1 %vm925_vm7, %v4226_v57  ;;  %v3141_v57 = vld [vmem:[%s4792_s4 + $0x70] sm:$0xff] }
 0x19d   : > { %3772 = vmatpush3.bf16.msk.msra.mxu1 %vm4067_vm6, %v3770_v20  ;;  %3520 = vmatprep.mubr.msk.f32.mxu1 %vm3857_vm1, %v3858_v6 }
 0x19e   : > { %3777 = vmatprep.subr.bf16.mxu1 %v3856_v3 }
 0x1a0   : > { %3521 = vmatmul.mubr.msk.f32.gmra.mrb[42].mxu1 %vm925_vm7, %v4237_v27  ;;  %v3142_v27 = vld [vmem:[%s4792_s4 + $0x78] sm:$0x3] }
 0x1a1   : > { %3523 = vmatprep.mubr.msk.f32.mxu1 %vm3857_vm1, %v3858_v6  ;;  %v3778_v21 = vpack.c.bf16 %v3142_v27, %v3141_v57 }
 0x1a4   : > { %3524 = vmatmul.mubr.msk.f32.gmra.mrb[44].mxu1 %vm925_vm7, %v4261_v29  ;;  %v3789_v29 = vpack.c.bf16 %v1951_v26, %v1950_v12 }
 0x1a5   : > { %3526 = vmatprep.mubr.msk.f32.mxu1 %vm3857_vm1, %v3858_v6 }
 0x1a6   : > { %3790 = vmatpush3.bf16.msra.mxu0 %v3789_v29 }
 0x1a7   : > { %3794 = vmatprep.subr.bf16.mxu0 %v3856_v3 }
 0x1a8   : > { %3527 = vmatmul.mubr.msk.f32.gmra.mrb[46].mxu1 %vm925_vm7, %v4284_v36 }
 0x1a9   : > { %3529 = vmatprep.mubr.msk.f32.mxu1 %vm3857_vm1, %v3858_v6 }
 0x1ac   : > { %3530 = vmatmul.mubr.msk.f32.gmra.mrb[48].mxu1 %vm925_vm7, %v4289_v38 }
 0x1ad   : > { %3536 = vmatprep.mubr.msk.f32.mxu1 %vm3857_vm1, %v3858_v6 }
 0x1b0   : > { %3537 = vmatmul.mubr.msk.f32.vlgmr.msra.gmra.mrb[50].mxu1 %vm925_vm7, %v4264_v30 }
 0x1b1   : > { %3780 = vmatpush3.bf16.msk.msra.mxu1 %vm4067_vm6, %v3778_v21  ;;  %3539 = vmatprep.mubr.msk.f32.mxu1 %vm3857_vm1, %v3858_v6  ;;  %vm1963_vm6 = vcmask 130048  }
 0x1b2   : > { %3785 = vmatprep.subr.bf16.mxu1 %v3856_v3 }
 0x1b4   : > { %3540 = vmatmul.mubr.msk.f32.gmra.mrb[52].mxu1 %vm925_vm7, %v4292_v41 }
 0x1b5   : > { %3542 = vmatprep.mubr.msk.f32.mxu1 %vm3857_vm1, %v3858_v6 }
 0x1b8   : > { %3543 = vmatmul.mubr.msk.f32.gmra.mrb[54].mxu1 %vm925_vm7, %v4309_v63 }
 0x1b9   : > { %3545 = vmatprep.mubr.msk.f32.mxu1 %vm3857_vm1, %v3858_v6 }
 0x1bc   : > { %3546 = vmatmul.mubr.msk.f32.gmra.mrb[56].mxu1 %vm925_vm7, %v1482_v33 }
 0x1bd   : > { %3548 = vmatprep.mubr.msk.f32.mxu1 %vm3857_vm1, %v3858_v6 }
 0x1c0   : > { %3549 = vmatmul.mubr.msk.f32.gmra.mrb[58].mxu1 %vm925_vm7, %v1481_v23 }
 0x1c1   : > { %3574 = vmatprep.mubr.msk.f32.mxu1 %vm3857_vm1, %v3858_v6 }
 0x1c4   : > { %3575 = vmatmul.mubr.msk.f32.vlgmr.msra.gmra.mrb[60].mxu1 %vm925_vm7, %v1261_v22 }
 0x1c5   : > { %3577 = vmatprep.mubr.msk.f32.mxu1 %vm3857_vm1, %v3858_v6  ;;  %3787 = vmatpush3.bf16.msra.mxu1 %v3786_v62 }
 0x1c6   : > { %3791 = vmatprep.subr.bf16.mxu1 %v3856_v3 }
 0x1c8   : > { %3578 = vmatmul.mubr.msk.f32.gmra.mrb[62].mxu1 %vm925_vm7, %v1263_v40 }
 0x1c9   : > { %3580 = vmatprep.mubr.msk.f32.mxu1 %vm3857_vm1, %v3858_v6 }
 0x1cc   : > { %3581 = vmatmul.mubr.msk.f32.gmra.mrb[64].mxu1 %vm925_vm7, %v1265_v17 }
 0x1cd   : > { %3583 = vmatprep.mubr.msk.f32.mxu1 %vm3857_vm1, %v3858_v6 }
 0x1d0   : > { %3584 = vmatmul.mubr.msk.f32.gmra.mrb[66].mxu1 %vm925_vm7, %v1709_v37 }
 0x1d1   : > { %3586 = vmatprep.mubr.msk.f32.mxu1 %vm3857_vm1, %v3858_v6 }
 0x1d4   : > { %3587 = vmatmul.mubr.msk.f32.gmra.mrb[68].mxu1 %vm925_vm7, %v1708_v34  ;;  %vm2992_vm7 = vcmask 48128  }
 0x1d5   : > { %3612 = vmatprep.mubr.msk.f32.mxu1 %vm3857_vm1, %v3858_v6 }
 0x21f   : > { %v1006_v28 = vpop.f32.mrb[0].mxu1 }
 0x220   : > { %v3443_v30 = vpop.f32.mrb[1].mxu1 }
 0x223   : > { %v1011_v31 = vpop.f32.mrb[2].mxu1  ;;  %v4535_v32 = vpop.f32.mrb[50].mxu0 }
 0x224   : > { %v3446_v45 = vpop.f32.mrb[3].mxu1  ;;  %v3557_v48 = vpop.f32.mrb[51].mxu0 }
 0x227   : > { %v1016_v51 = vpop.f32.mrb[4].mxu1  ;;  %v4537_v15 = vpop.f32.mrb[52].mxu0 }
 0x228   : > { %v3449_v35 = vpop.f32.mrb[5].mxu1  ;;  %v3560_v36 = vpop.f32.mrb[53].mxu0 }
 0x22b   : > { %v1021_v38 = vpop.f32.mrb[6].mxu1  ;;  %v4539_v41 = vpop.f32.mrb[54].mxu0 }
 0x22c   : > { %v3452_v7 = vpop.f32.mrb[7].mxu1  ;;  %v3563_v59 = vpop.f32.mrb[55].mxu0 }
 0x22f   : > { %v1026_v60 = vpop.f32.mrb[8].mxu1  ;;  %v4541_v63 = vpop.f32.mrb[56].mxu0 }
 0x230   : > { %v3455_v4 = vpop.f32.mrb[9].mxu1  ;;  %v3566_v5 = vpop.f32.mrb[57].mxu0 }
 0x233   : > { %v1109_v9 = vpop.f32.mrb[10].mxu1  ;;  %v4543_v42 = vpop.f32.mrb[58].mxu0 }
 0x234   : > { %v1110_v43 = vadd.f32 %v1109_v9, %v1006_v28  ;;  %v3462_v44 = vpop.f32.mrb[11].mxu1  ;;  %v3569_v46 = vpop.f32.mrb[59].mxu0 }
 0x237   : > { %v1114_v47 = vpop.f32.mrb[12].mxu1  ;;  %v4545_v11 = vpop.f32.mrb[60].mxu0 }
 0x238   : > { %v1115_v14 = vadd.f32 %v1114_v47, %v1011_v31  ;;  %v3465_v16 = vpop.f32.mrb[13].mxu1  ;;  %v3595_v18 = vpop.f32.mrb[61].mxu0 }
 0x23b   : > { %v1119_v49 = vpop.f32.mrb[14].mxu1  ;;  %v4547_v53 = vpop.f32.mrb[62].mxu0 }
 0x23c   : > { %v1120_v54 = vadd.f32 %v1119_v49, %v1016_v51  ;;  %v3468_v55 = vpop.f32.mrb[15].mxu1  ;;  %v3598_v58 = vpop.f32.mrb[63].mxu0 }
 0x23f   : > { %v1124_v50 = vpop.f32.mrb[16].mxu1  ;;  %v4549_v61 = vpop.f32.mrb[64].mxu0 }
 0x240   : > { %v1125_v1 = vadd.f32 %v1124_v50, %v1021_v38  ;;  %v3471_v2 = vpop.f32.mrb[17].mxu1  ;;  %v3601_v8 = vpop.f32.mrb[65].mxu0 }
 0x243   : > { %v1129_v52 = vpop.f32.mrb[18].mxu1  ;;  %v4551_v10 = vpop.f32.mrb[66].mxu0 }
 0x244   : > { %v1130_v13 = vadd.f32 %v1129_v52, %v1026_v60  ;;  %v3474_v22 = vpop.f32.mrb[19].mxu1  ;;  %v3604_v25 = vpop.f32.mrb[67].mxu0 }
 0x247   : > { %v1224_v40 = vpop.f32.mrb[20].mxu1  ;;  %v4553_v0 = vpop.f32.mrb[68].mxu0 }
 0x248   : > { %v1248_v17 = vadd.f32 %v1224_v40, %v1110_v43  ;;  %v3481_v56 = vpop.f32.mrb[21].mxu1  ;;  %v3607_v19 = vpop.f32.mrb[69].mxu0 }
 0x24b   : > { %v1229_v20 = vpop.f32.mrb[22].mxu1 }
 0x24c   : > { %v1249_v57 = vadd.f32 %v1229_v20, %v1115_v14  ;;  %v3484_v27 = vpop.f32.mrb[23].mxu1 }
 0x24f   : > { %v1234_v21 = vpop.f32.mrb[24].mxu1 }
 0x250   : > { %v1250_v23 = vadd.f32 %v1234_v21, %v1120_v54  ;;  %v3487_v33 = vpop.f32.mrb[25].mxu1 }
 0x253   : > { %v1239_v34 = vpop.f32.mrb[26].mxu1 }
 0x254   : > { %v1251_v37 = vadd.f32 %v1239_v34, %v1125_v1  ;;  %v3490_v39 = vpop.f32.mrb[27].mxu1 }
 0x257   : > { %v1244_v24 = vpop.f32.mrb[28].mxu1 }
 0x258   : > { %v1252_v62 = vadd.f32 %v1244_v24, %v1130_v13  ;;  %v3493_v12 = vpop.f32.mrb[29].mxu1 }
 0x25b   : > { %v1345_v26 = vpop.f32.mrb[30].mxu1 }
 0x25c   : > { %v1369_v29 = vadd.f32 %v1345_v26, %v1248_v17  ;;  %v3500_v28 = vpop.f32.mrb[31].mxu1  ;;  %v4569_v26 = vld [vmem:[%s4794_s6] ss:$0 sm:$0xff] }
 0x25f   : > { %v1350_v30 = vpop.f32.mrb[32].mxu1 }
 0x260   : > { %v1370_v31 = vadd.f32 %v1350_v30, %v1249_v57  ;;  %v3503_v45 = vpop.f32.mrb[33].mxu1 }
 0x263   : > { %v1355_v48 = vpop.f32.mrb[34].mxu1 }
 0x264   : > { %v1371_v51 = vadd.f32 %v1355_v48, %v1250_v23  ;;  %v3506_v35 = vpop.f32.mrb[35].mxu1 }
 0x267   : > { %v1360_v36 = vpop.f32.mrb[36].mxu1 }
 0x268   : > { %v1372_v38 = vadd.f32 %v1360_v36, %v1251_v37  ;;  %v3509_v7 = vpop.f32.mrb[37].mxu1 }
 0x26b   : > { %v1365_v59 = vpop.f32.mrb[38].mxu1 }
 0x26c   : > { %v1373_v60 = vadd.f32 %v1365_v59, %v1252_v62  ;;  %v3512_v4 = vpop.f32.mrb[39].mxu1  ;;  %v3167_v59 = vld [vmem:[%s4795_s7 + $0x20] sm:$0xff] }
 0x26f   : > { %v1449_v5 = vpop.f32.mrb[40].mxu1 }
 0x270   : > { %v1473_v9 = vadd.f32 %v1449_v5, %v1369_v29  ;;  %v3519_v43 = vpop.f32.mrb[41].mxu1  ;;  %v3173_v29 = vld [vmem:[%s4795_s7 + $0x38] sm:$0xff] }
 0x273   : > { %v1454_v44 = vpop.f32.mrb[42].mxu1 }
 0x274   : > { %v1474_v46 = vadd.f32 %v1454_v44, %v1370_v31  ;;  %v3522_v47 = vpop.f32.mrb[43].mxu1 }
 0x277   : > { %v1459_v14 = vpop.f32.mrb[44].mxu1 }
 0x278   : > { %v1475_v16 = vadd.f32 %v1459_v14, %v1371_v51  ;;  %v3525_v18 = vpop.f32.mrb[45].mxu1 }
 0x27b   : > { %v1464_v49 = vpop.f32.mrb[46].mxu1 }
 0x27c   : > { %v1476_v54 = vadd.f32 %v1464_v49, %v1372_v38  ;;  %v3528_v55 = vpop.f32.mrb[47].mxu1 }
 0x27f   : > { %v1469_v58 = vpop.f32.mrb[48].mxu1 }
 0x280   : > { %v1477_v50 = vadd.f32 %v1469_v58, %v1373_v60  ;;  %v3531_v1 = vpop.f32.mrb[49].mxu1  ;;  %v3168_v60 = vld [vmem:[%s4795_s7 + $0x28] sm:$0xff] }
 0x281   : > { %v3792_v43 = vpack.c.bf16 %v3168_v60, %v3167_v59 }
 0x283   : > { %v1556_v2 = vpop.f32.mrb[50].mxu1 }
 0x284   : > { %v1580_v8 = vadd.f32 %v1556_v2, %v1473_v9  ;;  %v3538_v52 = vpop.f32.mrb[51].mxu1 }
 0x285   : > { %v3182_v52 = vld [vmem:[%s4795_s7 + $0x50] sm:$0xff] }
 0x286   : > { %v1700_v13 = vadd.f32 %v4535_v32, %v1580_v8 }
 0x287   : > { %v1561_v22 = vpop.f32.mrb[52].mxu1 }
 0x288   : > { %v1581_v25 = vadd.f32 %v1561_v22, %v1474_v46  ;;  %v3541_v40 = vpop.f32.mrb[53].mxu1 }
 0x28a   : > { %v1701_v17 = vadd.f32 %v4537_v15, %v1581_v25  ;;  %v4563_v15 = vld [vmem:[%s4793_s5] ss:$0 sm:$0xff] }
 0x28b   : > { %v1566_v56 = vpop.f32.mrb[54].mxu1 }
 0x28c   : > { %v1582_v19 = vadd.f32 %v1566_v56, %v1475_v16  ;;  %v3544_v20 = vpop.f32.mrb[55].mxu1 }
 0x28e   : > { %v1702_v57 = vadd.f32 %v4539_v41, %v1582_v19 }
 0x28f   : > { %v1571_v27 = vpop.f32.mrb[56].mxu1 }
 0x290   : > { %v1583_v21 = vadd.f32 %v1571_v27, %v1476_v54  ;;  %v3547_v23 = vpop.f32.mrb[57].mxu1 }
 0x292   : > { %v1703_v33 = vadd.f32 %v4541_v63, %v1583_v21 }
 0x293   : > { %v1576_v34 = vpop.f32.mrb[58].mxu1 }
 0x294   : > { %v1584_v37 = vadd.f32 %v1576_v34, %v1477_v50  ;;  %v3550_v39 = vpop.f32.mrb[59].mxu1 }
 0x296   : > { %v1704_v32 = vadd.f32 %v4543_v42, %v1584_v37  ;;  %v3172_v42 = vld [vmem:[%s4795_s7 + $0x30] sm:$0xff] }
 0x297   : > { %v1783_v24 = vpop.f32.mrb[60].mxu1  ;;  %v3795_v48 = vpack.c.bf16 %v3173_v29, %v3172_v42 }
 0x298   : > { %v1807_v62 = vadd.f32 %v1783_v24, %v1700_v13  ;;  %v3576_v12 = vpop.f32.mrb[61].mxu1  ;;  %v3183_v13 = vld [vmem:[%s4795_s7 + $0x58] sm:$0xff] }
 0x299   : > { %v3801_v23 = vpack.c.bf16 %v3183_v13, %v3182_v52  ;;  %v3177_v12 = vld [vmem:[%s4795_s7 + $0x40] sm:$0xff] }
 0x29a   : > { %v1911_v41 = vadd.f32 %v4545_v11, %v1807_v62 }
 0x29b   : > { %v1788_v63 = vpop.f32.mrb[62].mxu1 }
 0x29c   : > { %v1923_v28 = vadd.f32 %v4563_v15, %v1911_v41  ;;  %v1808_v30 = vadd.f32 %v1788_v63, %v1701_v17  ;;  %v3579_v31 = vpop.f32.mrb[63].mxu1  ;;  %v3178_v41 = vld [vmem:[%s4795_s7 + $0x48] sm:$0xff] }
 0x29d   : > { %v3193_v31 = vld [vmem:[%s4795_s7 + $0x78] sm:$0xff] }
 0x29e   : > { %vm1928_vm12 = vcmp.gt.f32.partialorder %v1923_v28, 0.0  ;;  %v1940_v11 = vmul.f32 %v4569_v26, %v1923_v28  ;;  %v1912_v45 = vadd.f32 %v4547_v53, %v1808_v30  ;;  %v3192_v30 = vld [vmem:[%s4795_s7 + $0x70] sm:$0xff] }
 0x29f   : > { %v1793_v51 = vpop.f32.mrb[64].mxu1 }
 0x2a0   : > { %v1924_v35 = vadd.f32 %v4563_v15, %v1912_v45  ;;  %v1809_v36 = vadd.f32 %v1793_v51, %v1702_v57  ;;  %v3582_v38 = vpop.f32.mrb[65].mxu1  ;;  %v1945_v7 = vsel %vm1928_vm12, %v1923_v28, %v1940_v11  ;;  %v3798_v28 = vpack.c.bf16 %v3178_v41, %v3177_v12  ;;  %v3187_v45 = vld [vmem:[%s4795_s7 + $0x60] sm:$0xff] }
 0x2a1   : > { %3626 = vmatmul.mubr.msk.f32.vlgmr.msra.gmra.mrb[70].mxu0 %vm1963_vm6, %v1945_v7  ;;  %v1958_v5 = vrot.slane %v1945_v7, 1  ;;  %v2139_v46 = vrot.slane %v1945_v7, 2  ;;  %v2236_v18 = vrot.slane %v1945_v7, 7  ;;  %v3807_v11 = vpack.c.bf16 %v3193_v31, %v3192_v30 }
 0x2a2   : > { %vm1929_vm13 = vcmp.gt.f32.partialorder %v1924_v35, 0.0  ;;  %v1941_v53 = vmul.f32 %v4569_v26, %v1924_v35  ;;  %v1913_v4 = vadd.f32 %v4549_v61, %v1809_v36  ;;  %3628 = vmatprep.mubr.msk.f32.mxu0 %vm3857_vm1, %v3858_v6  ;;  %3796 = vmatpush3.bf16.msra.mxu0 %v3795_v48  ;;  %v3188_v48 = vld [vmem:[%s4795_s7 + $0x68] sm:$0xff] }
 0x2a3   : > { %v1798_v9 = vpop.f32.mrb[66].mxu1  ;;  %3800 = vmatprep.subr.bf16.mxu0 %v3856_v3  ;;  %v3804_v51 = vpack.c.bf16 %v3188_v48, %v3187_v45  ;;  %v3198_v36 = vld [vmem:[%s4795_s7 + $0x88] sm:$0xff] }
 0x2a4   : > { %v1925_v44 = vadd.f32 %v4563_v15, %v1913_v4  ;;  %v1810_v47 = vadd.f32 %v1798_v9, %v1703_v33  ;;  %v3585_v14 = vpop.f32.mrb[67].mxu1  ;;  %v4594_v16 = vsel %vm1929_vm13, %v1924_v35, %v1941_v53  ;;  %v3197_v35 = vld [vmem:[%s4795_s7 + $0x80] sm:$0xff]  ;;  %v2816_v53 = vld [vmem:[%s4798_s10 + $0x8] sm:$0xff] }
 0x2a5   : > { %3629 = vmatmul.mubr.msk.f32.gmra.mrb[72].mxu0 %vm1963_vm6, %v4594_v16  ;;  %v1959_v61 = vrot.slane %v4594_v16, 1  ;;  %v2237_v49 = vrot.slane %v4594_v16, 7  ;;  %v2140_v54 = vrot.slane %v4594_v16, 2  ;;  %v2514_v17 = vrot.slane %v4594_v16, 6 }
 0x2a6   : > { %vm1930_vm14 = vcmp.gt.f32.partialorder %v1925_v44, 0.0  ;;  %v1942_v55 = vmul.f32 %v4569_v26, %v1925_v44  ;;  %v1914_v58 = vadd.f32 %v4551_v10, %v1810_v47  ;;  %3631 = vmatprep.mubr.msk.f32.mxu0 %vm3857_vm1, %v3858_v6  ;;  %v3810_v38 = vpack.c.bf16 %v3198_v36, %v3197_v35 }
 0x2a7   : > { %v1803_v50 = vpop.f32.mrb[68].mxu1  ;;  %v1960_v1 = vsel %vm809_vm10, %v1958_v5, %v1959_v61  ;;  %v2238_v2 = vsel %vm1256_vm11, %v2236_v18, %v2237_v49  ;;  %v2141_v8 = vsel %vm878_vm15, %v2139_v46, %v2140_v54  ;;  %v2818_v5 = vld [vmem:[%s4798_s10 + $0x18] sm:$0xff] }
 0x2a8   : > { %v4614_v22 = vsel %vm1930_vm14, %v1925_v44, %v1942_v55  ;;  %v1926_v10 = vadd.f32 %v4563_v15, %v1914_v58  ;;  %v1811_v25 = vadd.f32 %v1803_v50, %v1704_v32  ;;  %v3588_v40 = vpop.f32.mrb[69].mxu1  ;;  %3613 = vmatmul.mubr.msk.f32.vlgmr.msra.gmra.mrb[70].mxu1 %vm1963_vm6, %v1960_v1 }
 0x2a9   : > { %3793 = vmatpush3.bf16.msra.mxu1 %v3792_v43  ;;  %3632 = vmatmul.mubr.msk.f32.gmra.mrb[74].mxu0 %vm1963_vm6, %v4614_v22  ;;  %v1961_v56 = vrot.slane %v4614_v22, 1  ;;  %v2239_v19 = vrot.slane %v4614_v22, 7  ;;  %v2142_v20 = vrot.slane %v4614_v22, 2  ;;  %v2515_v57 = vrot.slane %v4614_v22, 6 }
 0x2aa   : > { %vm1931_vm0 = vcmp.gt.f32.partialorder %v1926_v10, 0.0  ;;  %v1943_v27 = vmul.f32 %v4569_v26, %v1926_v10  ;;  %v4627_v21 = vadd.f32 %v4553_v0, %v1811_v25  ;;  %3615 = vmatprep.mubr.msk.f32.mxu1 %vm3857_vm1, %v3858_v6  ;;  %3651 = vmatprep.mubr.msk.f32.mxu0 %vm3857_vm1, %v3858_v6 }
 0x2ab   : > { %v1962_v33 = vsel %vm809_vm10, %v1959_v61, %v1961_v56  ;;  %v2240_v34 = vsel %vm1256_vm11, %v2237_v49, %v2239_v19  ;;  %3797 = vmatprep.subr.bf16.mxu1 %v3856_v3  ;;  %v2143_v37 = vsel %vm878_vm15, %v2140_v54, %v2142_v20  ;;  %v2516_v39 = vsel %vm936_vm5, %v2514_v17, %v2515_v57 }
 0x2ac   : > { %v4638_v32 = vsel %vm1931_vm0, %v1926_v10, %v1943_v27  ;;  %3616 = vmatmul.mubr.msk.f32.gmra.mrb[72].mxu1 %vm1963_vm6, %v1962_v33  ;;  %v1927_v7 = vadd.f32 %v4563_v15, %v4627_v21  ;;  %v2815_v15 = vld [vmem:[%s4798_s10] sm:$0xff]  ;;  %vm2826_vm15 = vcmask 261120  }
 0x2ad   : > { %3652 = vmatmul.mubr.msk.f32.vlgmr.msra.gmra.mrb[76].mxu0 %vm1963_vm6, %v2238_v2  ;;  %3618 = vmatprep.mubr.msk.f32.mxu1 %vm3857_vm1, %v3858_v6  ;;  %v2422_v0 = vrot.slane %v4638_v32, 1  ;;  %v2611_v24 = vrot.slane %v4638_v32, 7  ;;  %v2517_v62 = vrot.slane %v4638_v32, 6  ;;  %v3813_v4 = vpack.c.bf16 %v2816_v53, %v2815_v15 }
 0x2ae   : > { %3654 = vmatprep.mubr.msk.f32.mxu0 %vm3857_vm1, %v3858_v6  ;;  %3802 = vmatpush3.bf16.msra.mxu0 %v3801_v23  ;;  %v1944_v59 = vmul.f32 %v4569_v26, %v1927_v7  ;;  %v2817_v26 = vld [vmem:[%s4798_s10 + $0x10] sm:$0xff] }
 0x2af   : > { %v2423_v63 = vsel %vm809_vm10, %v1961_v56, %v2422_v0  ;;  %3806 = vmatprep.subr.bf16.mxu0 %v3856_v3  ;;  %v2612_v42 = vsel %vm1256_vm11, %v2239_v19, %v2611_v24  ;;  %v2518_v29 = vsel %vm936_vm5, %v2515_v57, %v2517_v62  ;;  %vm1932_vm5 = vcmp.gt.f32.partialorder %v1927_v7, 0.0 }
 0x2b0   : > { %3619 = vmatmul.mubr.msk.f32.gmra.mrb[74].mxu1 %vm1963_vm6, %v1961_v56  ;;  %v1949_v60 = vsel %vm1932_vm5, %v1927_v7, %v1944_v59  ;;  %v3816_v9 = vpack.c.bf16 %v2818_v5, %v2817_v26 }
 0x2b1   : > { %3655 = vmatmul.mubr.msk.f32.gmra.mrb[78].mxu0 %vm1963_vm6, %v2240_v34  ;;  %3638 = vmatprep.mubr.msk.f32.mxu1 %vm3857_vm1, %v3858_v6 }
 0x2b2   : > { %3657 = vmatprep.mubr.msk.f32.mxu0 %vm3857_vm1, %v3858_v6 }
 0x2b4   : > { %3639 = vmatmul.mubr.msk.f32.vlgmr.msra.gmra.mrb[76].mxu1 %vm1963_vm6, %v2141_v8 }
 0x2b5   : > { %3799 = vmatpush3.bf16.msra.mxu1 %v3798_v28  ;;  %3658 = vmatmul.mubr.msk.f32.gmra.mrb[80].mxu0 %vm1963_vm6, %v2239_v19 }
 0x2b6   : > { %3641 = vmatprep.mubr.msk.f32.mxu1 %vm3857_vm1, %v3858_v6  ;;  %3677 = vmatprep.mubr.msk.f32.mxu0 %vm3857_vm1, %v3858_v6 }
 0x2b7   : > { %3803 = vmatprep.subr.bf16.mxu1 %v3856_v3 }
 0x2b8   : > { %3642 = vmatmul.mubr.msk.f32.gmra.mrb[78].mxu1 %vm1963_vm6, %v2143_v37 }
 0x2b9   : > { %3678 = vmatmul.mubr.msk.f32.vlgmr.msra.gmra.mrb[82].mxu0 %vm1963_vm6, %v1962_v33  ;;  %3644 = vmatprep.mubr.msk.f32.mxu1 %vm3857_vm1, %v3858_v6 }
 0x2ba   : > { %3680 = vmatprep.mubr.msk.f32.mxu0 %vm3857_vm1, %v3858_v6  ;;  %3808 = vmatpush3.bf16.msra.mxu0 %v3807_v11 }
 0x2bb   : > { %3812 = vmatprep.subr.bf16.mxu0 %v3856_v3 }
 0x2bc   : > { %3645 = vmatmul.mubr.msk.f32.gmra.mrb[80].mxu1 %vm1963_vm6, %v2142_v20 }
 0x2bd   : > { %3681 = vmatmul.mubr.msk.f32.gmra.mrb[84].mxu0 %vm1963_vm6, %v2423_v63  ;;  %3664 = vmatprep.mubr.msk.f32.mxu1 %vm3857_vm1, %v3858_v6 }
 0x2be   : > { %3683 = vmatprep.mubr.msk.f32.mxu0 %vm3857_vm1, %v3858_v6 }
 0x2c0   : > { %3665 = vmatmul.mubr.msk.f32.vlgmr.msra.gmra.mrb[82].mxu1 %vm1963_vm6, %v4594_v16 }
 0x2c1   : > { %3805 = vmatpush3.bf16.msra.mxu1 %v3804_v51  ;;  %3684 = vmatmul.mubr.msk.f32.gmra.mrb[86].mxu0 %vm1963_vm6, %v2422_v0 }
 0x2c2   : > { %3667 = vmatprep.mubr.msk.f32.mxu1 %vm3857_vm1, %v3858_v6  ;;  %3703 = vmatprep.mubr.msk.f32.mxu0 %vm3857_vm1, %v3858_v6 }
 0x2c3   : > { %3809 = vmatprep.subr.bf16.mxu1 %v3856_v3 }
 0x2c4   : > { %3668 = vmatmul.mubr.msk.f32.gmra.mrb[84].mxu1 %vm1963_vm6, %v4614_v22 }
 0x2c5   : > { %3704 = vmatmul.mubr.msk.f32.vlgmr.msra.gmra.mrb[88].mxu0 %vm1963_vm6, %v2240_v34  ;;  %3670 = vmatprep.mubr.msk.f32.mxu1 %vm3857_vm1, %v3858_v6 }
 0x2c6   : > { %3706 = vmatprep.mubr.msk.f32.mxu0 %vm3857_vm1, %v3858_v6  ;;  %3814 = vmatpush3.bf16.msra.mxu0 %v3813_v4 }
 0x2c7   : > { %3815 = vmatprep.subr.bf16.mxu0 %v3856_v3 }
 0x2c8   : > { %3671 = vmatmul.mubr.msk.f32.gmra.mrb[86].mxu1 %vm1963_vm6, %v4638_v32 }
 0x2c9   : > { %3707 = vmatmul.mubr.msk.f32.gmra.mrb[90].mxu0 %vm1963_vm6, %v2612_v42  ;;  %3690 = vmatprep.mubr.msk.f32.mxu1 %vm3857_vm1, %v3858_v6 }
 0x2ca   : > { %3709 = vmatprep.mubr.msk.f32.mxu0 %vm3857_vm1, %v3858_v6  ;;  %3817 = vmatpush3.bf16.msra.mxu0 %v3816_v9 }
 0x2cc   : > { %3691 = vmatmul.mubr.msk.f32.vlgmr.msra.gmra.mrb[88].mxu1 %vm1963_vm6, %v2516_v39 }
 0x2cd   : > { %3811 = vmatpush3.bf16.msra.mxu1 %v3810_v38  ;;  %3710 = vmatmul.mubr.msk.f32.gmra.mrb[92].mxu0 %vm1963_vm6, %v2611_v24 }
 0x2ce   : > { %3693 = vmatprep.mubr.msk.f32.mxu1 %vm3857_vm1, %v3858_v6  ;;  %3733 = vmatprep.mubr.msk.f32.mxu0 %vm3857_vm1, %v3858_v6 }
 0x2d0   : > { %3694 = vmatmul.mubr.msk.f32.gmra.mrb[90].mxu1 %vm1963_vm6, %v2518_v29 }
 0x2d1   : > { %3696 = vmatprep.mubr.msk.f32.mxu1 %vm3857_vm1, %v3858_v6 }
 0x2d4   : > { %3697 = vmatmul.mubr.msk.f32.gmra.mrb[92].mxu1 %vm1963_vm6, %v2517_v62 }
 0x2d5   : > { %3716 = vmatprep.mubr.msk.f32.mxu1 %vm3857_vm1, %v3858_v6 }
 0x2d8   : > { %3717 = vmatmul.mubr.msk.f32.vlgmr.msra.gmra.mrb[94].mxu1 %vm1963_vm6, %v4614_v22 }
 0x2d9   : > { %3719 = vmatprep.mubr.msk.f32.mxu1 %vm3857_vm1, %v3858_v6 }
 0x2dc   : > { %3720 = vmatmul.mubr.msk.f32.gmra.mrb[96].mxu1 %vm1963_vm6, %v4638_v32 }
 0x2dd   : > { %3722 = vmatprep.mubr.msk.f32.mxu1 %vm3857_vm1, %v3858_v6 }
 0x2e0   : > { %3723 = vmatmul.mubr.msk.f32.gmra.mrb[98].mxu1 %vm1963_vm6, %v1949_v60 }
 0x374   : > { %v2122_v43 = vpop.f32.mrb[70].mxu0 }
 0x375   : > { %v3627_v44 = vpop.f32.mrb[71].mxu0 }
 0x378   : > { %v2127_v46 = vpop.f32.mrb[72].mxu0 }
 0x379   : > { %v3630_v47 = vpop.f32.mrb[73].mxu0 }
 0x37b   : > { %v2036_v14 = vpop.f32.mrb[70].mxu1 }
 0x37c   : > { %v2123_v16 = vadd.f32 %v2122_v43, %v2036_v14  ;;  %v3614_v18 = vpop.f32.mrb[71].mxu1  ;;  %v2132_v61 = vpop.f32.mrb[74].mxu0 }
 0x37d   : > { %v3633_v49 = vpop.f32.mrb[75].mxu0 }
 0x37f   : > { %v2041_v3 = vpop.f32.mrb[72].mxu1 }
 0x380   : > { %v2128_v54 = vadd.f32 %v2127_v46, %v2041_v3  ;;  %v3617_v55 = vpop.f32.mrb[73].mxu1  ;;  %v2313_v58 = vpop.f32.mrb[76].mxu0 }
 0x381   : > { %v3653_v50 = vpop.f32.mrb[77].mxu0 }
 0x383   : > { %v2046_v1 = vpop.f32.mrb[74].mxu1 }
 0x384   : > { %v2133_v2 = vadd.f32 %v2132_v61, %v2046_v1  ;;  %v3620_v8 = vpop.f32.mrb[75].mxu1  ;;  %v2318_v52 = vpop.f32.mrb[78].mxu0  ;;  %v3202_v61 = vld [vmem:[%s4796_s8] ss:$0 sm:$0xff] }
 0x385   : > { %v3656_v13 = vpop.f32.mrb[79].mxu0 }
 0x387   : > { %v2216_v22 = vpop.f32.mrb[76].mxu1 }
 0x388   : > { %v2230_v10 = vadd.f32 %v2216_v22, %v2123_v16  ;;  %v3640_v25 = vpop.f32.mrb[77].mxu1  ;;  %v2323_v40 = vpop.f32.mrb[80].mxu0 }
 0x389   : > { %v3659_v17 = vpop.f32.mrb[81].mxu0 }
 0x38a   : > { %v2327_v56 = vadd.f32 %v2313_v58, %v2230_v10 }
 0x38b   : > { %v2221_v19 = vpop.f32.mrb[78].mxu1 }
 0x38c   : > { %v2231_v20 = vadd.f32 %v2221_v19, %v2128_v54  ;;  %v3643_v57 = vpop.f32.mrb[79].mxu1  ;;  %v2494_v27 = vpop.f32.mrb[82].mxu0  ;;  %v3203_v54 = vld [vmem:[%s4797_s9] ss:$0 sm:$0xff] }
 0x38d   : > { %v3679_v21 = vpop.f32.mrb[83].mxu0 }
 0x38e   : > { %v2328_v23 = vadd.f32 %v2318_v52, %v2231_v20  ;;  %v3204_v20 = vld [vmem:[%s4799_s11] ss:$0 sm:$0xff] }
 0x38f   : > { %v2226_v33 = vpop.f32.mrb[80].mxu1 }
 0x390   : > { %v2232_v34 = vadd.f32 %v2226_v33, %v2133_v2  ;;  %v3646_v37 = vpop.f32.mrb[81].mxu1  ;;  %v2499_v39 = vpop.f32.mrb[84].mxu0 }
 0x391   : > { %v3682_v32 = vpop.f32.mrb[85].mxu0 }
 0x392   : > { %v2329_v0 = vadd.f32 %v2323_v40, %v2232_v34  ;;  %v3861_v32 = vmov 1  }
 0x393   : > { %v2402_v24 = vpop.f32.mrb[82].mxu1  ;;  %3834 = vset.pattern.permute.xlu1 %v3861_v32  ;;  %3835 = vset.pattern.permute.xlu0 %v3861_v32 }
 0x394   : > { %v2416_v62 = vadd.f32 %v2402_v24, %v2327_v56  ;;  %v3666_v12 = vpop.f32.mrb[83].mxu1  ;;  %v2504_v41 = vpop.f32.mrb[86].mxu0 }
 0x395   : > { %v3685_v63 = vpop.f32.mrb[87].mxu0 }
 0x396   : > { %v2508_v42 = vadd.f32 %v2494_v27, %v2416_v62 }
 0x397   : > { %v2407_v29 = vpop.f32.mrb[84].mxu1 }
 0x398   : > { %v2417_v28 = vadd.f32 %v2407_v29, %v2328_v23  ;;  %v3669_v30 = vpop.f32.mrb[85].mxu1  ;;  %v2683_v31 = vpop.f32.mrb[88].mxu0 }
 0x399   : > { %v3705_v11 = vpop.f32.mrb[89].mxu0 }
 0x39a   : > { %v2509_v45 = vadd.f32 %v2499_v39, %v2417_v28 }
 0x39b   : > { %v2412_v48 = vpop.f32.mrb[86].mxu1 }
 0x39c   : > { %v2418_v51 = vadd.f32 %v2412_v48, %v2329_v0  ;;  %v3672_v35 = vpop.f32.mrb[87].mxu1  ;;  %v2688_v36 = vpop.f32.mrb[90].mxu0 }
 0x39d   : > { %v3708_v38 = vpop.f32.mrb[91].mxu0 }
 0x39e   : > { %v2510_v7 = vadd.f32 %v2504_v41, %v2418_v51 }
 0x39f   : > { %v2591_v59 = vpop.f32.mrb[88].mxu1 }
 0x3a0   : > { %v2605_v60 = vadd.f32 %v2591_v59, %v2508_v42  ;;  %v3692_v15 = vpop.f32.mrb[89].mxu1  ;;  %v2693_v53 = vpop.f32.mrb[92].mxu0 }
 0x3a1   : > { %v3711_v4 = vpop.f32.mrb[93].mxu0 }
 0x3a2   : > { %v2697_v26 = vadd.f32 %v2683_v31, %v2605_v60 }
 0x3a3   : > { %v2596_v5 = vpop.f32.mrb[90].mxu1 }
 0x3a4   : > { %v2606_v9 = vadd.f32 %v2596_v5, %v2509_v45  ;;  %v3695_v43 = vpop.f32.mrb[91].mxu1 }
 0x3a6   : > { %v2698_v44 = vadd.f32 %v2688_v36, %v2606_v9 }
 0x3a7   : > { %v2601_v46 = vpop.f32.mrb[92].mxu1 }
 0x3a8   : > { %v2607_v47 = vadd.f32 %v2601_v46, %v2510_v7  ;;  %v3698_v14 = vpop.f32.mrb[93].mxu1 }
 0x3aa   : > { %v2699_v16 = vadd.f32 %v2693_v53, %v2607_v47 }
 0x3ab   : > { %v2772_v18 = vpop.f32.mrb[94].mxu1 }
 0x3ac   : > { %v2786_v49 = vadd.f32 %v2772_v18, %v2697_v26  ;;  %v3718_v3 = vpop.f32.mrb[95].mxu1  ;;  %v2949_v26 = vlaneseq }
 0x3ae   : > { %v2796_v55 = vadd.f32 %v3202_v61, %v2786_v49  ;;  %v2950_v5 = vand.u32 127, %v2949_v26 }
 0x3af   : > { %v2777_v58 = vpop.f32.mrb[96].mxu1 }
 0x3b0   : > { %vm2799_vm10 = vcmp.gt.f32.partialorder %v2796_v55, 0.0  ;;  %v2809_v50 = vmul.f32 %v3203_v54, %v2796_v55  ;;  %v2787_v1 = vadd.f32 %v2777_v58, %v2698_v44  ;;  %v3721_v2 = vpop.f32.mrb[97].mxu1  ;;  %vm2951_vm4 = vcmp.eq.s32.totalorder %v2950_v5, 0 }
 0x3b2   : > { %v2812_v8 = vsel %vm2799_vm10, %v2796_v55, %v2809_v50  ;;  %v2797_v52 = vadd.f32 %v3202_v61, %v2787_v1 }
 0x3b3   : > { %v2782_v13 = vpop.f32.mrb[98].mxu1  ;;  %3734 = vmatmul.mubr.msk.f32.vlgmr.msra.gmra.mrb[94].mxu0 %vm2826_vm15, %v2812_v8 }
 0x3b4   : > { %v2810_v22 = vmul.f32 %v3203_v54, %v2797_v52  ;;  %v2788_v10 = vadd.f32 %v2782_v13, %v2699_v16  ;;  %v3724_v25 = vpop.f32.mrb[99].mxu1  ;;  %3736 = vmatprep.mubr.msk.f32.mxu0 %vm3857_vm1, %v3858_v6  ;;  %vm2800_vm2 = vcmp.gt.f32.partialorder %v2797_v52, 0.0 }
 0x3b6   : > { %v2798_v40 = vadd.f32 %v3202_v61, %v2788_v10  ;;  %v2813_v17 = vsel %vm2800_vm2, %v2797_v52, %v2810_v22 }
 0x3b7   : > { %3737 = vmatmul.mubr.msk.f32.gmra.mrb[96].mxu0 %vm2826_vm15, %v2813_v17 }
 0x3b8   : > { %v2811_v56 = vmul.f32 %v3203_v54, %v2798_v40  ;;  %3739 = vmatprep.mubr.msk.f32.mxu0 %vm3857_vm1, %v3858_v6  ;;  %vm2801_vm3 = vcmp.gt.f32.partialorder %v2798_v40, 0.0  ;;  %vm2955_vm1 = vcmp.eq.s32.totalorder %v2950_v5, 1 }
 0x3ba   : > { %v2814_v19 = vsel %vm2801_vm3, %v2798_v40, %v2811_v56 }
 0x3bb   : > { %3740 = vmatmul.mubr.msk.f32.gmra.mrb[98].mxu0 %vm2826_vm15, %v2814_v19 }
 0x486   : > { %v2902_v57 = vpop.f32.mrb[94].mxu0 }
 0x487   : > { %v2903_v27 = vadd.f32 %v3204_v20, %v2902_v57  ;;  %v3735_v21 = vpop.f32.mrb[95].mxu0 }
 0x489   : > { %2919 = vrot.lane.b32.xlu0 %v2903_v27, %s3860_s15 }
 0x48a   : > { %v2907_v23 = vpop.f32.mrb[96].mxu0 }
 0x48b   : > { %v2908_v33 = vadd.f32 %v3204_v20, %v2907_v23  ;;  %v3738_v34 = vpop.f32.mrb[97].mxu0 }
 0x48d   : > { %2921 = vrot.lane.b32.xlu0 %v2908_v33, %s3860_s15 }
 0x48e   : > { %v2912_v37 = vpop.f32.mrb[98].mxu0 }
 0x48f   : > { %v2913_v39 = vadd.f32 %v3204_v20, %v2912_v37  ;;  %v3741_v6 = vpop.f32.mrb[99].mxu0 }
 0x491   : > { %2923 = vrot.lane.b32.xlu1 %v2913_v39, %s3860_s15 }
 0x4fb   : > { %v2920_v0 = vpop.permute.xlu0 %2919 }
 0x4fc   : > { %v2928_v24 = vsub.f32 %v2903_v27, %v2920_v0 }
 0x4fe   : > { %v2931_v62 = vsub.f32 0.0, %v2928_v24 }
 0x4ff   : > { %v2922_v12 = vpop.permute.xlu0 %2921 }
 0x500   : > { %v2934_v41 = vmul.f32 1.442695, %v2931_v62  ;;  %v2929_v63 = vsub.f32 %v2908_v33, %v2922_v12 }
 0x502   : > { %3836 = vpow2.f32 %v2934_v41  ;;  %v2932_v42 = vsub.f32 0.0, %v2929_v63 }
 0x503   : > { %v2924_v29 = vpop.permute.xlu1 %2923 }
 0x504   : > { %v2936_v28 = vmul.f32 1.442695, %v2932_v42  ;;  %v2930_v30 = vsub.f32 %v2913_v39, %v2924_v29 }
 0x506   : > { %3838 = vpow2.f32 %v2936_v28  ;;  %v2933_v31 = vsub.f32 0.0, %v2930_v30 }
 0x508   : > { %v2938_v11 = vmul.f32 1.442695, %v2933_v31 }
 0x50a   : > { %3840 = vpow2.f32 %v2938_v11 }
 0x50c   : > { %v3837_v45 = vpop.eup %3836 }
 0x50d   : > { %v2940_v48 = vadd.f32 1.0, %v3837_v45 }
 0x50f   : > { %3842 = vrcp.f32 %v2940_v48 }
 0x510   : > { %v3839_v51 = vpop.eup %3838 }
 0x511   : > { %v2941_v35 = vadd.f32 1.0, %v3839_v51 }
 0x513   : > { %3844 = vrcp.f32 %v2941_v35 }
 0x514   : > { %v3841_v36 = vpop.eup %3840 }
 0x515   : > { %v2942_v38 = vadd.f32 1.0, %v3841_v36 }
 0x517   : > { %3846 = vrcp.f32 %v2942_v38 }
 0x519   : > { %v3843_v7 = vpop.eup %3842 }
 0x51a   : > { %2958 = vperm.xlu1 %3834, %v3843_v7   ;;  %v2952_v59 = vsub.f32 1.0, %v3843_v7 }
 0x51d   : > { %v3845_v60 = vpop.eup %3844 }
 0x51e   : > { %2963 = vperm.xlu0 %3835, %v3845_v60   ;;  %2976 = vperm.xlu1 %3834, %v2952_v59   ;;  %v2953_v15 = vsub.f32 1.0, %v3845_v60 }
 0x521   : > { %v3847_v53 = vpop.eup %3846 }
 0x522   : > { %2981 = vperm.xlu0 %3835, %v2953_v15   ;;  %2968 = vperm.xlu1 %3834, %v3847_v53   ;;  %v2954_v4 = vsub.f32 1.0, %v3847_v53 }
 0x526   : > { %2986 = vperm.xlu1 %3834, %v2954_v4  }
 0x599   : > { %v2959_v9 = vpop.permute.xlu1 %2958 }
 0x59a   : > { %v2971_v43 = vsel %vm2955_vm1, %v2959_v9, %v2903_v27 }
 0x59d   : > { %v2964_v44 = vpop.permute.xlu0 %2963  ;;  %v2977_v46 = vpop.permute.xlu1 %2976 }
 0x59e   : > { %v2989_v47 = vsel %vm2951_vm4, %v2977_v46, %v2971_v43  ;;  %v2972_v14 = vsel %vm2955_vm1, %v2964_v44, %v2908_v33 }
 0x59f   : > { %2993 = vst.msk [vmem:[%s413_s19] sm:$0xff] %vm2992_vm7, %v2989_v47 }
 0x5a1   : > { %v2982_v16 = vpop.permute.xlu0 %2981  ;;  %v2969_v18 = vpop.permute.xlu1 %2968 }
 0x5a2   : > { %v2990_v61 = vsel %vm2951_vm4, %v2982_v16, %v2972_v14  ;;  %v2973_v49 = vsel %vm2955_vm1, %v2969_v18, %v2913_v39 }
 0x5a3   : > { %2994 = vst.msk [vmem:[%s413_s19 + $0x8] sm:$0xff] %vm2992_vm7, %v2990_v61 }
 0x5a5   : > { %v2987_v3 = vpop.permute.xlu1 %2986 }
 0x5a6   : > { %v2991_v54 = vsel %vm2951_vm4, %v2987_v3, %v2973_v49 }
 0x5a7   : > { %2996 = vst.msk [vmem:[%s413_s19 + $0x10] sm:$0x1] %vm2995_vm8, %v2991_v54 }
 0x5a8 PF: > { %s22_s21 = sadd.s32 1, %s3854_s21  }
 0x5a9   : > { %p19_p4 = scmp.ge.s32.totalorder %s22_s21, 4  }
 0x5ab   :  { %21 = sbr.rel (!%p19_p4) target bundleno = 1 (0x1), region = 114 }

</bundles_post_ra>
